<compile_context>
chip_gen: v7x
topology: tpu7x:2x2x1
jax: 0.10.0
libtpu: 0.0.40
codegen_flags: <defaults>
</compile_context>

<pallas_src>
import functools
import math

import jax
import jax.numpy as jnp
from jax.experimental import pallas as pl
from jax.experimental.pallas import tpu as pltpu

_EPS = 1e-6
_ROW_TILE = 256          # rows per grid step for the matmul-family kernels


def _row_tile(m):
    # Full array if small, else a 256-row tile (multiple of 8 sublanes).
    return m if m <= _ROW_TILE else _ROW_TILE


def _cparams():
    return pltpu.CompilerParams(
        dimension_semantics=("parallel",),
        vmem_limit_bytes=32 * 1024 * 1024)


# ---------------------------------------------------------------------------
# In-kernel helpers
# ---------------------------------------------------------------------------
def _layernorm_f32(x, alpha, beta, eps):
    # torch Norm: alpha*(x-mean)/(std_unbiased+eps)+beta ; all stats in f32.
    d = x.shape[-1]
    mean = jnp.mean(x, axis=-1, keepdims=True)
    c = x - mean
    var = jnp.sum(c * c, axis=-1, keepdims=True) / (d - 1)
    return alpha * c / (jnp.sqrt(var) + eps) + beta


# ---------------------------------------------------------------------------
# Pallas kernels
# ---------------------------------------------------------------------------
def _ln_matmul_kernel(x_ref, a_ref, g_ref, w_ref, b_ref, o_ref, *, eps):
    xn = _layernorm_f32(x_ref[...], a_ref[...], g_ref[...], eps)
    o_ref[...] = jnp.dot(xn.astype(jnp.bfloat16), w_ref[...],
                         preferred_element_type=jnp.float32) + b_ref[...]


def _matmul_kernel(x_ref, w_ref, b_ref, o_ref):
    o_ref[...] = jnp.dot(x_ref[...].astype(jnp.bfloat16), w_ref[...],
                         preferred_element_type=jnp.float32) + b_ref[...]


def _matmul_res_kernel(x_ref, w_ref, b_ref, r_ref, o_ref):
    o_ref[...] = (jnp.dot(x_ref[...].astype(jnp.bfloat16), w_ref[...],
                          preferred_element_type=jnp.float32)
                  + b_ref[...] + r_ref[...])


def _ln_ffn_res_kernel(x_ref, a_ref, g_ref, w1_ref, b1_ref, w2_ref, b2_ref,
                       o_ref, *, eps):
    x = x_ref[...]
    xn = _layernorm_f32(x, a_ref[...], g_ref[...], eps)
    h = jnp.dot(xn.astype(jnp.bfloat16), w1_ref[...],
                preferred_element_type=jnp.float32) + b1_ref[...]
    h = jnp.maximum(h, 0.0)                                     # relu
    o_ref[...] = (jnp.dot(h.astype(jnp.bfloat16), w2_ref[...],
                          preferred_element_type=jnp.float32)
                  + b2_ref[...] + x)                            # + residual


def _ln_kernel(x_ref, a_ref, g_ref, o_ref, *, eps):
    o_ref[...] = _layernorm_f32(x_ref[...], a_ref[...], g_ref[...], eps)


def _attn_kernel(q_ref, k_ref, v_ref, m_ref, o_ref, *, n_heads, head_dim,
                 inv_scale):
    q = q_ref[0] * inv_scale            # (Lq, hid) f32; 1/scale folded into q
    k = k_ref[0]                        # (Lk, hid)
    v = v_ref[0]                        # (Lk, hid)
    masked = m_ref[0] == 0.0            # (Lq, Lk)
    outs = []
    for h in range(n_heads):            # static unroll over heads
        cols = slice(h * head_dim, (h + 1) * head_dim)
        qh = q[:, cols].astype(jnp.bfloat16)
        kh = k[:, cols].astype(jnp.bfloat16)
        vh = v[:, cols].astype(jnp.bfloat16)
        # contract last dims (no explicit k.T); f32 accumulation on the MXU
        e = jax.lax.dot_general(qh, kh, (((1,), (1,)), ((), ())),
                                preferred_element_type=jnp.float32)
        e = jnp.where(masked, jnp.float32(-1e10), e)   # masked_fill(mask==0)
        e = e - jnp.max(e, axis=-1, keepdims=True)     # softmax stats in f32
        p = jnp.exp(e)
        pn = p * pl.reciprocal(jnp.sum(p, axis=-1, keepdims=True), approx=True)
        outs.append(jax.lax.dot_general(pn.astype(jnp.bfloat16), vh,
                                        (((1,), (0,)), ((), ())),
                                        preferred_element_type=jnp.float32))
    # single lane-dense store carrying all heads
    o_ref[0] = jnp.concatenate(outs, axis=-1)


# ---------------------------------------------------------------------------
# Pallas wrappers
# ---------------------------------------------------------------------------
def ln_matmul(x, alpha, beta, w, b, eps=_EPS):
    """layernorm(x) @ w + b, row-tiled.  x:(M,D) w:(D,Dout) -> (M,Dout)."""
    M, D = x.shape
    Dout = w.shape[1]
    tm = _row_tile(M)
    return pl.pallas_call(
        functools.partial(_ln_matmul_kernel, eps=eps),
        out_shape=jax.ShapeDtypeStruct((M, Dout), jnp.float32),
        grid=(pl.cdiv(M, tm),),
        in_specs=[pl.BlockSpec((tm, D), lambda i: (i, 0)),
                  pl.BlockSpec((1, D), lambda i: (0, 0)),
                  pl.BlockSpec((1, D), lambda i: (0, 0)),
                  pl.BlockSpec((D, Dout), lambda i: (0, 0)),
                  pl.BlockSpec((1, Dout), lambda i: (0, 0))],
        out_specs=pl.BlockSpec((tm, Dout), lambda i: (i, 0)),
        compiler_params=_cparams(),
    )(x, alpha.reshape(1, D), beta.reshape(1, D),
      w.astype(jnp.bfloat16), b.reshape(1, Dout))


def matmul_bias(x, w, b):
    """x @ w + b, row-tiled."""
    M, D = x.shape
    Dout = w.shape[1]
    tm = _row_tile(M)
    return pl.pallas_call(
        _matmul_kernel,
        out_shape=jax.ShapeDtypeStruct((M, Dout), jnp.float32),
        grid=(pl.cdiv(M, tm),),
        in_specs=[pl.BlockSpec((tm, D), lambda i: (i, 0)),
                  pl.BlockSpec((D, Dout), lambda i: (0, 0)),
                  pl.BlockSpec((1, Dout), lambda i: (0, 0))],
        out_specs=pl.BlockSpec((tm, Dout), lambda i: (i, 0)),
        compiler_params=_cparams(),
    )(x, w.astype(jnp.bfloat16), b.reshape(1, Dout))


def matmul_bias_residual(x, w, b, residual):
    """x @ w + b + residual, row-tiled (output projection fused with residual)."""
    M, D = x.shape
    Dout = w.shape[1]
    tm = _row_tile(M)
    return pl.pallas_call(
        _matmul_res_kernel,
        out_shape=jax.ShapeDtypeStruct((M, Dout), jnp.float32),
        grid=(pl.cdiv(M, tm),),
        in_specs=[pl.BlockSpec((tm, D), lambda i: (i, 0)),
                  pl.BlockSpec((D, Dout), lambda i: (0, 0)),
                  pl.BlockSpec((1, Dout), lambda i: (0, 0)),
                  pl.BlockSpec((tm, Dout), lambda i: (i, 0))],
        out_specs=pl.BlockSpec((tm, Dout), lambda i: (i, 0)),
        compiler_params=_cparams(),
    )(x, w.astype(jnp.bfloat16), b.reshape(1, Dout), residual)


def ln_ffn_residual(x, alpha, beta, w1, b1, w2, b2, eps=_EPS):
    """x + relu(layernorm(x) @ w1 + b1) @ w2 + b2, row-tiled, fully fused."""
    # TODO(synk): for very large hid/pf the (D,P)/(P,D) weight slabs should be
    # K/N-tiled with a VMEM accumulator; at these sizes they fit comfortably.
    M, D = x.shape
    P = w1.shape[1]
    tm = _row_tile(M)
    return pl.pallas_call(
        functools.partial(_ln_ffn_res_kernel, eps=eps),
        out_shape=jax.ShapeDtypeStruct((M, D), jnp.float32),
        grid=(pl.cdiv(M, tm),),
        in_specs=[pl.BlockSpec((tm, D), lambda i: (i, 0)),
                  pl.BlockSpec((1, D), lambda i: (0, 0)),
                  pl.BlockSpec((1, D), lambda i: (0, 0)),
                  pl.BlockSpec((D, P), lambda i: (0, 0)),
                  pl.BlockSpec((1, P), lambda i: (0, 0)),
                  pl.BlockSpec((P, D), lambda i: (0, 0)),
                  pl.BlockSpec((1, D), lambda i: (0, 0))],
        out_specs=pl.BlockSpec((tm, D), lambda i: (i, 0)),
        compiler_params=_cparams(),
    )(x, alpha.reshape(1, D), beta.reshape(1, D),
      w1.astype(jnp.bfloat16), b1.reshape(1, P),
      w2.astype(jnp.bfloat16), b2.reshape(1, D))


def layer_norm(x, alpha, beta, eps=_EPS):
    M, D = x.shape
    tm = _row_tile(M)
    return pl.pallas_call(
        functools.partial(_ln_kernel, eps=eps),
        out_shape=jax.ShapeDtypeStruct((M, D), jnp.float32),
        grid=(pl.cdiv(M, tm),),
        in_specs=[pl.BlockSpec((tm, D), lambda i: (i, 0)),
                  pl.BlockSpec((1, D), lambda i: (0, 0)),
                  pl.BlockSpec((1, D), lambda i: (0, 0))],
        out_specs=pl.BlockSpec((tm, D), lambda i: (i, 0)),
        compiler_params=_cparams(),
    )(x, alpha.reshape(1, D), beta.reshape(1, D))


def attention(q, k, v, mask, n_heads):
    """q:(B,Lq,hid) k,v:(B,Lk,hid) mask:(B,Lq,Lk) -> (B,Lq,hid); per-batch grid,
    all heads handled inside the kernel (no JAX-side head transposes)."""
    B, Lq, hid = q.shape
    Lk = k.shape[1]
    hd = hid // n_heads
    return pl.pallas_call(
        functools.partial(_attn_kernel, n_heads=n_heads, head_dim=hd,
                          inv_scale=1.0 / math.sqrt(hd)),
        out_shape=jax.ShapeDtypeStruct((B, Lq, hid), jnp.float32),
        grid=(B,),
        in_specs=[pl.BlockSpec((1, Lq, hid), lambda b: (b, 0, 0)),
                  pl.BlockSpec((1, Lk, hid), lambda b: (b, 0, 0)),
                  pl.BlockSpec((1, Lk, hid), lambda b: (b, 0, 0)),
                  pl.BlockSpec((1, Lq, Lk), lambda b: (b, 0, 0))],
        out_specs=pl.BlockSpec((1, Lq, hid), lambda b: (b, 0, 0)),
        compiler_params=_cparams(),
    )(q, k, v, mask)


# ---------------------------------------------------------------------------
# Model composition (glue in plain JAX, hot paths above in Pallas)
# ---------------------------------------------------------------------------
def _prep_mask(mask, B, Lq, Lk):
    # collapse the (broadcast) head dim; never duplicate the mask per head
    return jnp.broadcast_to(mask, (B, 1, Lq, Lk)).reshape(B, Lq, Lk).astype(jnp.float32)


def decoder_layer(lp, trg, enc_src, trg_mask, src_mask, n_heads):
    B, L, hid = trg.shape
    Ls = enc_src.shape[1]
    trg_f = trg.reshape(B * L, hid)
    enc_f = enc_src.reshape(B * Ls, hid)

    # --- masked self-attention: LN1 fused into a single fused-QKV projection --
    a1 = lp['attn1']
    wqkv = jnp.concatenate([a1['wq'], a1['wk'], a1['wv']], axis=1)
    bqkv = jnp.concatenate([a1['bq'], a1['bk'], a1['bv']], axis=0)
    qkv = ln_matmul(trg_f, lp['ln1_a'], lp['ln1_b'], wqkv, bqkv)
    qkv = qkv.reshape(B, L, 3 * hid)
    q, k, v = qkv[..., :hid], qkv[..., hid:2 * hid], qkv[..., 2 * hid:]
    ctx = attention(q, k, v, _prep_mask(trg_mask, B, L, L), n_heads)
    # output projection fused with the residual add (dropout1 = identity, eval)
    trg_f = matmul_bias_residual(ctx.reshape(B * L, hid), a1['wo'], a1['bo'], trg_f)

    # --- cross-attention: LN2 fused into Q projection; fused K/V projection ---
    a2 = lp['attn2']
    q = ln_matmul(trg_f, lp['ln2_a'], lp['ln2_b'], a2['wq'], a2['bq'])
    q = q.reshape(B, L, hid)
    wkv = jnp.concatenate([a2['wk'], a2['wv']], axis=1)
    bkv = jnp.concatenate([a2['bk'], a2['bv']], axis=0)
    kv = matmul_bias(enc_f, wkv, bkv).reshape(B, Ls, 2 * hid)
    k, v = kv[..., :hid], kv[..., hid:]
    ctx = attention(q, k, v, _prep_mask(src_mask, B, L, Ls), n_heads)
    trg_f = matmul_bias_residual(ctx.reshape(B * L, hid), a2['wo'], a2['bo'], trg_f)

    # --- feed-forward: LN3 + fc1 + relu + fc2 + residual, single fused kernel -
    trg_f = ln_ffn_residual(trg_f, lp['ln3_a'], lp['ln3_b'],
                            lp['w1'], lp['b1'], lp['w2'], lp['b2'])
    return trg_f.reshape(B, L, hid)


def decoder_forward(params, trg_tokens, enc_src, trg_mask, src_mask, n_heads):
    B, L = trg_tokens.shape
    hid = params['tok_emb'].shape[1]
    assert hid % n_heads == 0
    # Embedding gathers (data-dependent lookup) + scale + positional add are
    # left to XLA; the review notes a standalone elementwise pallas_call costs
    # more than it saves.  Dropout = identity (eval mode).
    tok = params['tok_emb'][trg_tokens]                      # (B, L, hid)
    pos = params['pos_emb'][jnp.arange(L)][None]             # (1, L, hid)
    x = tok * math.sqrt(hid) + pos
    for lp in params['layers']:
        x = decoder_layer(lp, x, enc_src, trg_mask, src_mask, n_heads)
    return layer_norm(x.reshape(B * L, hid),
                      params['norm_a'], params['norm_b']).reshape(B, L, hid)


# ---------------------------------------------------------------------------
# deterministic parameter init (synthetic, matches module __init__ shapes)
# ---------------------------------------------------------------------------
def init_params(key, vocab, max_len, hid, n_layers, pf):
    keys = iter(jax.random.split(key, 8 + n_layers * 32))

    def lin(din, dout):
        w = jax.random.normal(next(keys), (din, dout), jnp.float32) * 0.05
        b = jax.random.normal(next(keys), (dout,), jnp.float32) * 0.05
        return w, b

    params = {
        'tok_emb': jax.random.normal(next(keys), (vocab, hid), jnp.float32) * 0.05,
        'pos_emb': jax.random.normal(next(keys), (max_len, hid), jnp.float32) * 0.05,
        'norm_a': jnp.ones((hid,), jnp.float32),
        'norm_b': jnp.zeros((hid,), jnp.float32),
        'layers': [],
    }
    for _ in range(n_layers):
        lp = {}
        for nm in ('ln1', 'ln2', 'ln3'):
            lp[nm + '_a'] = jnp.ones((hid,), jnp.float32)
            lp[nm + '_b'] = jnp.zeros((hid,), jnp.float32)
        for attn in ('attn1', 'attn2'):
            d = {}
            for nm in ('q', 'k', 'v', 'o'):
                w, b = lin(hid, hid)
                d['w' + nm] = w
                d['b' + nm] = b
            lp[attn] = d
        lp['w1'], lp['b1'] = lin(hid, pf)
        lp['w2'], lp['b2'] = lin(pf, hid)
        params['layers'].append(lp)
    return params


# ---------------------------------------------------------------------------
# pure-JAX reference (mirrors the kernels' bf16 matmul / f32 accumulation)
# ---------------------------------------------------------------------------
def _bdot(a, b):
    return jnp.dot(a.astype(jnp.bfloat16), b.astype(jnp.bfloat16),
                   preferred_element_type=jnp.float32)


def ref_forward(params, trg_tokens, enc_src, trg_mask, src_mask, n_heads):
    def ref_norm(x, a, b, eps=_EPS):
        mean = x.mean(-1, keepdims=True)
        c = x - mean
        std = jnp.sqrt((c * c).sum(-1, keepdims=True) / (x.shape[-1] - 1))
        return a * c / (std + eps) + b

    def ref_mha(p, q, k, v, mask):
        B, Lq, hid = q.shape
        hd = hid // n_heads
        Q = (_bdot(q, p['wq']) + p['bq']).reshape(B, Lq, n_heads, hd).transpose(0, 2, 1, 3)
        K = (_bdot(k, p['wk']) + p['bk']).reshape(B, -1, n_heads, hd).transpose(0, 2, 1, 3)
        V = (_bdot(v, p['wv']) + p['bv']).reshape(B, -1, n_heads, hd).transpose(0, 2, 1, 3)
        e = jnp.einsum('bhqd,bhkd->bhqk', Q.astype(jnp.bfloat16),
                       K.astype(jnp.bfloat16),
                       preferred_element_type=jnp.float32) / math.sqrt(hd)
        e = jnp.where(mask == 0, -1e10, e)
        a = jax.nn.softmax(e, -1)
        x = jnp.einsum('bhqk,bhkd->bhqd', a.astype(jnp.bfloat16),
                       V.astype(jnp.bfloat16),
                       preferred_element_type=jnp.float32)
        x = x.transpose(0, 2, 1, 3).reshape(B, Lq, hid)
        return _bdot(x, p['wo']) + p['bo']

    B, L = trg_tokens.shape
    hid = params['tok_emb'].shape[1]
    x = (params['tok_emb'][trg_tokens] * math.sqrt(hid)
         + params['pos_emb'][jnp.arange(L)][None])
    for lp in params['layers']:
        t = ref_norm(x, lp['ln1_a'], lp['ln1_b'])
        x = x + ref_mha(lp['attn1'], t, t, t, trg_mask)
        t = ref_norm(x, lp['ln2_a'], lp['ln2_b'])
        x = x + ref_mha(lp['attn2'], t, enc_src, enc_src, src_mask)
        t = ref_norm(x, lp['ln3_a'], lp['ln3_b'])
        x = x + (_bdot(jnp.maximum(_bdot(t, lp['w1']) + lp['b1'], 0.0),
                       lp['w2']) + lp['b2'])
    return ref_norm(x, params['norm_a'], params['norm_b'])


# ---------------------------------------------------------------------------
if __name__ == "__main__":
    B, L_trg, L_src = 2, 8, 8
    hid, n_layers, n_heads, pf = 32, 2, 4, 64
    vocab, max_len = 50, 32

    key = jax.random.PRNGKey(0)
    kp, kt, ke = jax.random.split(key, 3)
    params = init_params(kp, vocab, max_len, hid, n_layers, pf)

    trg_tokens = jax.random.randint(kt, (B, L_trg), 0, vocab)
    enc_src = jax.random.normal(ke, (B, L_src, hid), jnp.float32)

    # causal target mask (B,1,L,L); padded source mask (B,1,1,L_src)
    trg_mask = jnp.broadcast_to(
        jnp.tril(jnp.ones((L_trg, L_trg), jnp.float32))[None, None],
        (B, 1, L_trg, L_trg))
    src_pad = jnp.array([[1.0] * L_src,
                         [1.0] * (L_src - 3) + [0.0] * 3], jnp.float32)
    src_mask = src_pad[:, None, None, :]

    fwd = jax.jit(functools.partial(decoder_forward, n_heads=n_heads))
    out = fwd(params, trg_tokens, enc_src, trg_mask, src_mask)
    out = jax.block_until_ready(out)

    ref = ref_forward(params, trg_tokens, enc_src, trg_mask, src_mask, n_heads)
    assert out.shape == (B, L_trg, hid)
    assert bool(jnp.all(jnp.isfinite(out)))
    assert jnp.allclose(out, ref, atol=1e-2, rtol=1e-2), \
        f"max abs diff {jnp.max(jnp.abs(out - ref))}"

    print("KERNEL_OK")
</pallas_src>

<mosaic_0001>
module attributes {stable_mosaic.version = 11 : i64} {
  func.func @_ln_matmul_kernel(%arg0: i32, %arg1: memref<16x32xf32, #tpu.memory_space<vmem>>, %arg2: memref<1x32xf32, #tpu.memory_space<vmem>>, %arg3: memref<1x32xf32, #tpu.memory_space<vmem>>, %arg4: memref<32x96xbf16, #tpu.memory_space<vmem>>, %arg5: memref<1x96xf32, #tpu.memory_space<vmem>>, %arg6: memref<16x96xf32, #tpu.memory_space<vmem>>) attributes {dimension_semantics = [#tpu.dimension_semantics<parallel>], iteration_bounds = array<i64: 1>, scalar_prefetch = 0 : i64, scratch_operands = 0 : i64, tpu.core_type = #tpu.core_type<tc>, window_params = [{transform_indices = @transform_0, window_bounds = array<i64: 16, 32>}, {pipeline_mode = #tpu.pipeline_mode<synchronous>, transform_indices = @transform_1, window_bounds = array<i64: 1, 32>}, {pipeline_mode = #tpu.pipeline_mode<synchronous>, transform_indices = @transform_2, window_bounds = array<i64: 1, 32>}, {pipeline_mode = #tpu.pipeline_mode<synchronous>, transform_indices = @transform_3, window_bounds = array<i64: 32, 96>}, {pipeline_mode = #tpu.pipeline_mode<synchronous>, transform_indices = @transform_4, window_bounds = array<i64: 1, 96>}, {transform_indices = @transform_5, window_bounds = array<i64: 16, 96>}]} {
    %c0 = arith.constant 0 : index
    %c0_0 = arith.constant 0 : index
    %0 = vector.load %arg1[%c0, %c0_0] : memref<16x32xf32, #tpu.memory_space<vmem>>, vector<16x32xf32>
    %c0_1 = arith.constant 0 : index
    %c0_2 = arith.constant 0 : index
    %1 = vector.load %arg2[%c0_1, %c0_2] : memref<1x32xf32, #tpu.memory_space<vmem>>, vector<1x32xf32>
    %c0_3 = arith.constant 0 : index
    %c0_4 = arith.constant 0 : index
    %2 = vector.load %arg3[%c0_3, %c0_4] : memref<1x32xf32, #tpu.memory_space<vmem>>, vector<1x32xf32>
    %cst = arith.constant dense<0.000000e+00> : vector<16xf32>
    %3 = vector.multi_reduction <add>, %0, %cst [1] : vector<16x32xf32> to vector<16xf32>
    %4 = vector.shape_cast %3 : vector<16xf32> to vector<16x1xf32>
    %cst_5 = arith.constant 3.200000e+01 : f32
    %5 = vector.broadcast %cst_5 : f32 to vector<16x1xf32>
    %6 = arith.divf %4, %5 : vector<16x1xf32>
    %7 = vector.broadcast %6 : vector<16x1xf32> to vector<16x32xf32>
    %8 = arith.subf %0, %7 : vector<16x32xf32>
    %9 = arith.mulf %8, %8 : vector<16x32xf32>
    %cst_6 = arith.constant dense<0.000000e+00> : vector<16xf32>
    %10 = vector.multi_reduction <add>, %9, %cst_6 [1] : vector<16x32xf32> to vector<16xf32>
    %11 = vector.shape_cast %10 : vector<16xf32> to vector<16x1xf32>
    %cst_7 = arith.constant 3.100000e+01 : f32
    %12 = vector.broadcast %cst_7 : f32 to vector<16x1xf32>
    %13 = arith.divf %11, %12 : vector<16x1xf32>
    %14 = vector.broadcast %1 : vector<1x32xf32> to vector<16x32xf32>
    %15 = arith.mulf %14, %8 : vector<16x32xf32>
    %16 = math.sqrt %13 : vector<16x1xf32>
    %cst_8 = arith.constant 9.99999997E-7 : f32
    %17 = vector.broadcast %cst_8 : f32 to vector<16x1xf32>
    %18 = arith.addf %16, %17 : vector<16x1xf32>
    %19 = vector.broadcast %18 : vector<16x1xf32> to vector<16x32xf32>
    %20 = arith.divf %15, %19 : vector<16x32xf32>
    %21 = vector.broadcast %2 : vector<1x32xf32> to vector<16x32xf32>
    %22 = arith.addf %20, %21 : vector<16x32xf32>
    %23 = arith.truncf %22 : vector<16x32xf32> to vector<16x32xbf16>
    %c0_9 = arith.constant 0 : index
    %c0_10 = arith.constant 0 : index
    %24 = vector.load %arg4[%c0_9, %c0_10] : memref<32x96xbf16, #tpu.memory_space<vmem>>, vector<32x96xbf16>
    %cst_11 = arith.constant dense<0.000000e+00> : vector<16x96xf32>
    %25 = tpu.matmul %23, %24, %cst_11 {dimension_numbers = #tpu.dot_dimension_numbers<[1], [0], [0], [1], [0, 0, 1, 1], [], []>} : vector<16x32xbf16>, vector<32x96xbf16>, vector<16x96xf32> -> vector<16x96xf32>
    %c0_12 = arith.constant 0 : index
    %c0_13 = arith.constant 0 : index
    %26 = vector.load %arg5[%c0_12, %c0_13] : memref<1x96xf32, #tpu.memory_space<vmem>>, vector<1x96xf32>
    %27 = vector.broadcast %26 : vector<1x96xf32> to vector<16x96xf32>
    %28 = arith.addf %25, %27 : vector<16x96xf32>
    %c0_14 = arith.constant 0 : index
    %c0_15 = arith.constant 0 : index
    %29 = vector.load %arg6[%c0_14, %c0_15] : memref<16x96xf32, #tpu.memory_space<vmem>>, vector<16x96xf32>
    tpu.vector_store %arg6[%c0_14, %c0_15], %28 {strides = array<i32>} : memref<16x96xf32, #tpu.memory_space<vmem>>, vector<16x96xf32>,
    return
  }
  func.func @transform_0(%arg0: i32) -> (i32, i32) {
    %c0_i32 = arith.constant 0 : i32
    %c0_i32_0 = arith.constant 0 : i32
    return %arg0, %c0_i32 : i32, i32
  }
  func.func @transform_1(%arg0: i32) -> (i32, i32) {
    %c0_i32 = arith.constant 0 : i32
    %c0_i32_0 = arith.constant 0 : i32
    %c0_i32_1 = arith.constant 0 : i32
    return %c0_i32, %c0_i32_0 : i32, i32
  }
  func.func @transform_2(%arg0: i32) -> (i32, i32) {
    %c0_i32 = arith.constant 0 : i32
    %c0_i32_0 = arith.constant 0 : i32
    %c0_i32_1 = arith.constant 0 : i32
    return %c0_i32, %c0_i32_0 : i32, i32
  }
  func.func @transform_3(%arg0: i32) -> (i32, i32) {
    %c0_i32 = arith.constant 0 : i32
    %c0_i32_0 = arith.constant 0 : i32
    %c0_i32_1 = arith.constant 0 : i32
    return %c0_i32, %c0_i32_0 : i32, i32
  }
  func.func @transform_4(%arg0: i32) -> (i32, i32) {
    %c0_i32 = arith.constant 0 : i32
    %c0_i32_0 = arith.constant 0 : i32
    %c0_i32_1 = arith.constant 0 : i32
    return %c0_i32, %c0_i32_0 : i32, i32
  }
  func.func @transform_5(%arg0: i32) -> (i32, i32) {
    %c0_i32 = arith.constant 0 : i32
    %c0_i32_0 = arith.constant 0 : i32
    return %arg0, %c0_i32 : i32, i32
  }
}

module attributes {stable_mosaic.version = 11 : i64} {
  func.func @_ln_matmul_kernel(%arg0: i32, %arg1: memref<16x32xf32, #tpu.memory_space<vmem>>, %arg2: memref<1x32xf32, #tpu.memory_space<vmem>>, %arg3: memref<1x32xf32, #tpu.memory_space<vmem>>, %arg4: memref<32x32xbf16, #tpu.memory_space<vmem>>, %arg5: memref<1x32xf32, #tpu.memory_space<vmem>>, %arg6: memref<16x32xf32, #tpu.memory_space<vmem>>) attributes {dimension_semantics = [#tpu.dimension_semantics<parallel>], iteration_bounds = array<i64: 1>, scalar_prefetch = 0 : i64, scratch_operands = 0 : i64, tpu.core_type = #tpu.core_type<tc>, window_params = [{transform_indices = @transform_0, window_bounds = array<i64: 16, 32>}, {pipeline_mode = #tpu.pipeline_mode<synchronous>, transform_indices = @transform_1, window_bounds = array<i64: 1, 32>}, {pipeline_mode = #tpu.pipeline_mode<synchronous>, transform_indices = @transform_2, window_bounds = array<i64: 1, 32>}, {pipeline_mode = #tpu.pipeline_mode<synchronous>, transform_indices = @transform_3, window_bounds = array<i64: 32, 32>}, {pipeline_mode = #tpu.pipeline_mode<synchronous>, transform_indices = @transform_4, window_bounds = array<i64: 1, 32>}, {transform_indices = @transform_5, window_bounds = array<i64: 16, 32>}]} {
    %c0 = arith.constant 0 : index
    %c0_0 = arith.constant 0 : index
    %0 = vector.load %arg1[%c0, %c0_0] : memref<16x32xf32, #tpu.memory_space<vmem>>, vector<16x32xf32>
    %c0_1 = arith.constant 0 : index
    %c0_2 = arith.constant 0 : index
    %1 = vector.load %arg2[%c0_1, %c0_2] : memref<1x32xf32, #tpu.memory_space<vmem>>, vector<1x32xf32>
    %c0_3 = arith.constant 0 : index
    %c0_4 = arith.constant 0 : index
    %2 = vector.load %arg3[%c0_3, %c0_4] : memref<1x32xf32, #tpu.memory_space<vmem>>, vector<1x32xf32>
    %cst = arith.constant dense<0.000000e+00> : vector<16xf32>
    %3 = vector.multi_reduction <add>, %0, %cst [1] : vector<16x32xf32> to vector<16xf32>
    %4 = vector.shape_cast %3 : vector<16xf32> to vector<16x1xf32>
    %cst_5 = arith.constant 3.200000e+01 : f32
    %5 = vector.broadcast %cst_5 : f32 to vector<16x1xf32>
    %6 = arith.divf %4, %5 : vector<16x1xf32>
    %7 = vector.broadcast %6 : vector<16x1xf32> to vector<16x32xf32>
    %8 = arith.subf %0, %7 : vector<16x32xf32>
    %9 = arith.mulf %8, %8 : vector<16x32xf32>
    %cst_6 = arith.constant dense<0.000000e+00> : vector<16xf32>
    %10 = vector.multi_reduction <add>, %9, %cst_6 [1] : vector<16x32xf32> to vector<16xf32>
    %11 = vector.shape_cast %10 : vector<16xf32> to vector<16x1xf32>
    %cst_7 = arith.constant 3.100000e+01 : f32
    %12 = vector.broadcast %cst_7 : f32 to vector<16x1xf32>
    %13 = arith.divf %11, %12 : vector<16x1xf32>
    %14 = vector.broadcast %1 : vector<1x32xf32> to vector<16x32xf32>
    %15 = arith.mulf %14, %8 : vector<16x32xf32>
    %16 = math.sqrt %13 : vector<16x1xf32>
    %cst_8 = arith.constant 9.99999997E-7 : f32
    %17 = vector.broadcast %cst_8 : f32 to vector<16x1xf32>
    %18 = arith.addf %16, %17 : vector<16x1xf32>
    %19 = vector.broadcast %18 : vector<16x1xf32> to vector<16x32xf32>
    %20 = arith.divf %15, %19 : vector<16x32xf32>
    %21 = vector.broadcast %2 : vector<1x32xf32> to vector<16x32xf32>
    %22 = arith.addf %20, %21 : vector<16x32xf32>
    %23 = arith.truncf %22 : vector<16x32xf32> to vector<16x32xbf16>
    %c0_9 = arith.constant 0 : index
    %c0_10 = arith.constant 0 : index
    %24 = vector.load %arg4[%c0_9, %c0_10] : memref<32x32xbf16, #tpu.memory_space<vmem>>, vector<32x32xbf16>
    %cst_11 = arith.constant dense<0.000000e+00> : vector<16x32xf32>
    %25 = tpu.matmul %23, %24, %cst_11 {dimension_numbers = #tpu.dot_dimension_numbers<[1], [0], [0], [1], [0, 0, 1, 1], [], []>} : vector<16x32xbf16>, vector<32x32xbf16>, vector<16x32xf32> -> vector<16x32xf32>
    %c0_12 = arith.constant 0 : index
    %c0_13 = arith.constant 0 : index
    %26 = vector.load %arg5[%c0_12, %c0_13] : memref<1x32xf32, #tpu.memory_space<vmem>>, vector<1x32xf32>
    %27 = vector.broadcast %26 : vector<1x32xf32> to vector<16x32xf32>
    %28 = arith.addf %25, %27 : vector<16x32xf32>
    %c0_14 = arith.constant 0 : index
    %c0_15 = arith.constant 0 : index
    %29 = vector.load %arg6[%c0_14, %c0_15] : memref<16x32xf32, #tpu.memory_space<vmem>>, vector<16x32xf32>
    tpu.vector_store %arg6[%c0_14, %c0_15], %28 {strides = array<i32>} : memref<16x32xf32, #tpu.memory_space<vmem>>, vector<16x32xf32>,
    return
  }
  func.func @transform_0(%arg0: i32) -> (i32, i32) {
    %c0_i32 = arith.constant 0 : i32
    %c0_i32_0 = arith.constant 0 : i32
    return %arg0, %c0_i32 : i32, i32
  }
  func.func @transform_1(%arg0: i32) -> (i32, i32) {
    %c0_i32 = arith.constant 0 : i32
    %c0_i32_0 = arith.constant 0 : i32
    %c0_i32_1 = arith.constant 0 : i32
    return %c0_i32, %c0_i32_0 : i32, i32
  }
  func.func @transform_2(%arg0: i32) -> (i32, i32) {
    %c0_i32 = arith.constant 0 : i32
    %c0_i32_0 = arith.constant 0 : i32
    %c0_i32_1 = arith.constant 0 : i32
    return %c0_i32, %c0_i32_0 : i32, i32
  }
  func.func @transform_3(%arg0: i32) -> (i32, i32) {
    %c0_i32 = arith.constant 0 : i32
    %c0_i32_0 = arith.constant 0 : i32
    %c0_i32_1 = arith.constant 0 : i32
    return %c0_i32, %c0_i32_0 : i32, i32
  }
  func.func @transform_4(%arg0: i32) -> (i32, i32) {
    %c0_i32 = arith.constant 0 : i32
    %c0_i32_0 = arith.constant 0 : i32
    %c0_i32_1 = arith.constant 0 : i32
    return %c0_i32, %c0_i32_0 : i32, i32
  }
  func.func @transform_5(%arg0: i32) -> (i32, i32) {
    %c0_i32 = arith.constant 0 : i32
    %c0_i32_0 = arith.constant 0 : i32
    return %arg0, %c0_i32 : i32, i32
  }
}

module attributes {stable_mosaic.version = 11 : i64} {
  func.func @_matmul_res_kernel(%arg0: i32, %arg1: memref<16x32xf32, #tpu.memory_space<vmem>>, %arg2: memref<32x32xbf16, #tpu.memory_space<vmem>>, %arg3: memref<1x32xf32, #tpu.memory_space<vmem>>, %arg4: memref<16x32xf32, #tpu.memory_space<vmem>>, %arg5: memref<16x32xf32, #tpu.memory_space<vmem>>) attributes {dimension_semantics = [#tpu.dimension_semantics<parallel>], iteration_bounds = array<i64: 1>, scalar_prefetch = 0 : i64, scratch_operands = 0 : i64, tpu.core_type = #tpu.core_type<tc>, window_params = [{transform_indices = @transform_0, window_bounds = array<i64: 16, 32>}, {pipeline_mode = #tpu.pipeline_mode<synchronous>, transform_indices = @transform_1, window_bounds = array<i64: 32, 32>}, {pipeline_mode = #tpu.pipeline_mode<synchronous>, transform_indices = @transform_2, window_bounds = array<i64: 1, 32>}, {transform_indices = @transform_3, window_bounds = array<i64: 16, 32>}, {transform_indices = @transform_4, window_bounds = array<i64: 16, 32>}]} {
    %c0 = arith.constant 0 : index
    %c0_0 = arith.constant 0 : index
    %0 = vector.load %arg1[%c0, %c0_0] : memref<16x32xf32, #tpu.memory_space<vmem>>, vector<16x32xf32>
    %1 = arith.truncf %0 : vector<16x32xf32> to vector<16x32xbf16>
    %c0_1 = arith.constant 0 : index
    %c0_2 = arith.constant 0 : index
    %2 = vector.load %arg2[%c0_1, %c0_2] : memref<32x32xbf16, #tpu.memory_space<vmem>>, vector<32x32xbf16>
    %cst = arith.constant dense<0.000000e+00> : vector<16x32xf32>
    %3 = tpu.matmul %1, %2, %cst {dimension_numbers = #tpu.dot_dimension_numbers<[1], [0], [0], [1], [0, 0, 1, 1], [], []>} : vector<16x32xbf16>, vector<32x32xbf16>, vector<16x32xf32> -> vector<16x32xf32>
    %c0_3 = arith.constant 0 : index
    %c0_4 = arith.constant 0 : index
    %4 = vector.load %arg3[%c0_3, %c0_4] : memref<1x32xf32, #tpu.memory_space<vmem>>, vector<1x32xf32>
    %5 = vector.broadcast %4 : vector<1x32xf32> to vector<16x32xf32>
    %6 = arith.addf %3, %5 : vector<16x32xf32>
    %c0_5 = arith.constant 0 : index
    %c0_6 = arith.constant 0 : index
    %7 = vector.load %arg4[%c0_5, %c0_6] : memref<16x32xf32, #tpu.memory_space<vmem>>, vector<16x32xf32>
    %8 = arith.addf %6, %7 : vector<16x32xf32>
    %c0_7 = arith.constant 0 : index
    %c0_8 = arith.constant 0 : index
    %9 = vector.load %arg5[%c0_7, %c0_8] : memref<16x32xf32, #tpu.memory_space<vmem>>, vector<16x32xf32>
    tpu.vector_store %arg5[%c0_7, %c0_8], %8 {strides = array<i32>} : memref<16x32xf32, #tpu.memory_space<vmem>>, vector<16x32xf32>,
    return
  }
  func.func @transform_0(%arg0: i32) -> (i32, i32) {
    %c0_i32 = arith.constant 0 : i32
    %c0_i32_0 = arith.constant 0 : i32
    return %arg0, %c0_i32 : i32, i32
  }
  func.func @transform_1(%arg0: i32) -> (i32, i32) {
    %c0_i32 = arith.constant 0 : i32
    %c0_i32_0 = arith.constant 0 : i32
    %c0_i32_1 = arith.constant 0 : i32
    return %c0_i32, %c0_i32_0 : i32, i32
  }
  func.func @transform_2(%arg0: i32) -> (i32, i32) {
    %c0_i32 = arith.constant 0 : i32
    %c0_i32_0 = arith.constant 0 : i32
    %c0_i32_1 = arith.constant 0 : i32
    return %c0_i32, %c0_i32_0 : i32, i32
  }
  func.func @transform_3(%arg0: i32) -> (i32, i32) {
    %c0_i32 = arith.constant 0 : i32
    %c0_i32_0 = arith.constant 0 : i32
    return %arg0, %c0_i32 : i32, i32
  }
  func.func @transform_4(%arg0: i32) -> (i32, i32) {
    %c0_i32 = arith.constant 0 : i32
    %c0_i32_0 = arith.constant 0 : i32
    return %arg0, %c0_i32 : i32, i32
  }
}

module attributes {stable_mosaic.version = 11 : i64} {
  func.func @_attn_kernel(%arg0: i32, %arg1: memref<1x8x32xf32, #tpu.memory_space<vmem>>, %arg2: memref<1x8x32xf32, #tpu.memory_space<vmem>>, %arg3: memref<1x8x32xf32, #tpu.memory_space<vmem>>, %arg4: memref<1x8x8xf32, #tpu.memory_space<vmem>>, %arg5: memref<1x8x32xf32, #tpu.memory_space<vmem>>) attributes {dimension_semantics = [#tpu.dimension_semantics<parallel>], iteration_bounds = array<i64: 2>, scalar_prefetch = 0 : i64, scratch_operands = 0 : i64, tpu.core_type = #tpu.core_type<tc>, window_params = [{transform_indices = @transform_0, window_bounds = array<i64: 1, 8, 32>}, {transform_indices = @transform_1, window_bounds = array<i64: 1, 8, 32>}, {transform_indices = @transform_2, window_bounds = array<i64: 1, 8, 32>}, {transform_indices = @transform_3, window_bounds = array<i64: 1, 8, 8>}, {transform_indices = @transform_4, window_bounds = array<i64: 1, 8, 32>}]} {
    %c0 = arith.constant 0 : index
    %c0_0 = arith.constant 0 : index
    %c0_1 = arith.constant 0 : index
    %0 = vector.load %arg1[%c0, %c0_0, %c0_1] : memref<1x8x32xf32, #tpu.memory_space<vmem>>, vector<1x8x32xf32>
    %1 = vector.shape_cast %0 : vector<1x8x32xf32> to vector<8x32xf32>
    %cst = arith.constant 0.353553385 : f32
    %2 = vector.broadcast %cst : f32 to vector<8x32xf32>
    %3 = arith.mulf %1, %2 : vector<8x32xf32>
    %c0_2 = arith.constant 0 : index
    %c0_3 = arith.constant 0 : index
    %c0_4 = arith.constant 0 : index
    %4 = vector.load %arg2[%c0_2, %c0_3, %c0_4] : memref<1x8x32xf32, #tpu.memory_space<vmem>>, vector<1x8x32xf32>
    %5 = vector.shape_cast %4 : vector<1x8x32xf32> to vector<8x32xf32>
    %c0_5 = arith.constant 0 : index
    %c0_6 = arith.constant 0 : index
    %c0_7 = arith.constant 0 : index
    %6 = vector.load %arg3[%c0_5, %c0_6, %c0_7] : memref<1x8x32xf32, #tpu.memory_space<vmem>>, vector<1x8x32xf32>
    %7 = vector.shape_cast %6 : vector<1x8x32xf32> to vector<8x32xf32>
    %c0_8 = arith.constant 0 : index
    %c0_9 = arith.constant 0 : index
    %c0_10 = arith.constant 0 : index
    %8 = vector.load %arg4[%c0_8, %c0_9, %c0_10] : memref<1x8x8xf32, #tpu.memory_space<vmem>>, vector<1x8x8xf32>
    %9 = vector.shape_cast %8 : vector<1x8x8xf32> to vector<8x8xf32>
    %cst_11 = arith.constant 0.000000e+00 : f32
    %10 = vector.broadcast %cst_11 : f32 to vector<8x8xf32>
    %11 = arith.cmpf oeq, %9, %10 : vector<8x8xf32>
    %12 = vector.extract_strided_slice %3 {offsets = [0, 0], sizes = [8, 8], strides = [1, 1]} : vector<8x32xf32> to vector<8x8xf32>
    %13 = arith.truncf %12 : vector<8x8xf32> to vector<8x8xbf16>
    %14 = vector.extract_strided_slice %5 {offsets = [0, 0], sizes = [8, 8], strides = [1, 1]} : vector<8x32xf32> to vector<8x8xf32>
    %15 = arith.truncf %14 : vector<8x8xf32> to vector<8x8xbf16>
    %16 = vector.extract_strided_slice %7 {offsets = [0, 0], sizes = [8, 8], strides = [1, 1]} : vector<8x32xf32> to vector<8x8xf32>
    %17 = arith.truncf %16 : vector<8x8xf32> to vector<8x8xbf16>
    %cst_12 = arith.constant dense<0.000000e+00> : vector<8x8xf32>
    %18 = tpu.matmul %13, %15, %cst_12 {dimension_numbers = #tpu.dot_dimension_numbers<[1], [1], [0], [0], [0, 0, 1, 0], [], []>} : vector<8x8xbf16>, vector<8x8xbf16>, vector<8x8xf32> -> vector<8x8xf32>
    %cst_13 = arith.constant -1.000000e+10 : f32
    %19 = vector.broadcast %cst_13 : f32 to vector<8x8xf32>
    %20 = arith.select %11, %19, %18 : vector<8x8xi1>, vector<8x8xf32>
    %cst_14 = arith.constant dense<0xFF800000> : vector<8xf32>
    %21 = vector.multi_reduction <maximumf>, %20, %cst_14 [1] : vector<8x8xf32> to vector<8xf32>
    %22 = vector.shape_cast %21 : vector<8xf32> to vector<8x1xf32>
    %23 = vector.broadcast %22 : vector<8x1xf32> to vector<8x8xf32>
    %24 = arith.subf %20, %23 : vector<8x8xf32>
    %25 = math.exp %24 : vector<8x8xf32>
    %cst_15 = arith.constant dense<0.000000e+00> : vector<8xf32>
    %26 = vector.multi_reduction <add>, %25, %cst_15 [1] : vector<8x8xf32> to vector<8xf32>
    %27 = vector.shape_cast %26 : vector<8xf32> to vector<8x1xf32>
    %28 = tpu.reciprocal %27 {approx = true} : vector<8x1xf32> -> vector<8x1xf32>
    %29 = vector.broadcast %28 : vector<8x1xf32> to vector<8x8xf32>
    %30 = arith.mulf %25, %29 : vector<8x8xf32>
    %31 = arith.truncf %30 : vector<8x8xf32> to vector<8x8xbf16>
    %cst_16 = arith.constant dense<0.000000e+00> : vector<8x8xf32>
    %32 = tpu.matmul %31, %17, %cst_16 {dimension_numbers = #tpu.dot_dimension_numbers<[1], [0], [0], [1], [0, 0, 1, 1], [], []>} : vector<8x8xbf16>, vector<8x8xbf16>, vector<8x8xf32> -> vector<8x8xf32>
    %33 = vector.extract_strided_slice %3 {offsets = [0, 8], sizes = [8, 8], strides = [1, 1]} : vector<8x32xf32> to vector<8x8xf32>
    %34 = arith.truncf %33 : vector<8x8xf32> to vector<8x8xbf16>
    %35 = vector.extract_strided_slice %5 {offsets = [0, 8], sizes = [8, 8], strides = [1, 1]} : vector<8x32xf32> to vector<8x8xf32>
    %36 = arith.truncf %35 : vector<8x8xf32> to vector<8x8xbf16>
    %37 = vector.extract_strided_slice %7 {offsets = [0, 8], sizes = [8, 8], strides = [1, 1]} : vector<8x32xf32> to vector<8x8xf32>
    %38 = arith.truncf %37 : vector<8x8xf32> to vector<8x8xbf16>
    %cst_17 = arith.constant dense<0.000000e+00> : vector<8x8xf32>
    %39 = tpu.matmul %34, %36, %cst_17 {dimension_numbers = #tpu.dot_dimension_numbers<[1], [1], [0], [0], [0, 0, 1, 0], [], []>} : vector<8x8xbf16>, vector<8x8xbf16>, vector<8x8xf32> -> vector<8x8xf32>
    %cst_18 = arith.constant -1.000000e+10 : f32
    %40 = vector.broadcast %cst_18 : f32 to vector<8x8xf32>
    %41 = arith.select %11, %40, %39 : vector<8x8xi1>, vector<8x8xf32>
    %cst_19 = arith.constant dense<0xFF800000> : vector<8xf32>
    %42 = vector.multi_reduction <maximumf>, %41, %cst_19 [1] : vector<8x8xf32> to vector<8xf32>
    %43 = vector.shape_cast %42 : vector<8xf32> to vector<8x1xf32>
    %44 = vector.broadcast %43 : vector<8x1xf32> to vector<8x8xf32>
    %45 = arith.subf %41, %44 : vector<8x8xf32>
    %46 = math.exp %45 : vector<8x8xf32>
    %cst_20 = arith.constant dense<0.000000e+00> : vector<8xf32>
    %47 = vector.multi_reduction <add>, %46, %cst_20 [1] : vector<8x8xf32> to vector<8xf32>
    %48 = vector.shape_cast %47 : vector<8xf32> to vector<8x1xf32>
    %49 = tpu.reciprocal %48 {approx = true} : vector<8x1xf32> -> vector<8x1xf32>
    %50 = vector.broadcast %49 : vector<8x1xf32> to vector<8x8xf32>
    %51 = arith.mulf %46, %50 : vector<8x8xf32>
    %52 = arith.truncf %51 : vector<8x8xf32> to vector<8x8xbf16>
    %cst_21 = arith.constant dense<0.000000e+00> : vector<8x8xf32>
    %53 = tpu.matmul %52, %38, %cst_21 {dimension_numbers = #tpu.dot_dimension_numbers<[1], [0], [0], [1], [0, 0, 1, 1], [], []>} : vector<8x8xbf16>, vector<8x8xbf16>, vector<8x8xf32> -> vector<8x8xf32>
    %54 = vector.extract_strided_slice %3 {offsets = [0, 16], sizes = [8, 8], strides = [1, 1]} : vector<8x32xf32> to vector<8x8xf32>
    %55 = arith.truncf %54 : vector<8x8xf32> to vector<8x8xbf16>
    %56 = vector.extract_strided_slice %5 {offsets = [0, 16], sizes = [8, 8], strides = [1, 1]} : vector<8x32xf32> to vector<8x8xf32>
    %57 = arith.truncf %56 : vector<8x8xf32> to vector<8x8xbf16>
    %58 = vector.extract_strided_slice %7 {offsets = [0, 16], sizes = [8, 8], strides = [1, 1]} : vector<8x32xf32> to vector<8x8xf32>
    %59 = arith.truncf %58 : vector<8x8xf32> to vector<8x8xbf16>
    %cst_22 = arith.constant dense<0.000000e+00> : vector<8x8xf32>
    %60 = tpu.matmul %55, %57, %cst_22 {dimension_numbers = #tpu.dot_dimension_numbers<[1], [1], [0], [0], [0, 0, 1, 0], [], []>} : vector<8x8xbf16>, vector<8x8xbf16>, vector<8x8xf32> -> vector<8x8xf32>
    %cst_23 = arith.constant -1.000000e+10 : f32
    %61 = vector.broadcast %cst_23 : f32 to vector<8x8xf32>
    %62 = arith.select %11, %61, %60 : vector<8x8xi1>, vector<8x8xf32>
    %cst_24 = arith.constant dense<0xFF800000> : vector<8xf32>
    %63 = vector.multi_reduction <maximumf>, %62, %cst_24 [1] : vector<8x8xf32> to vector<8xf32>
    %64 = vector.shape_cast %63 : vector<8xf32> to vector<8x1xf32>
    %65 = vector.broadcast %64 : vector<8x1xf32> to vector<8x8xf32>
    %66 = arith.subf %62, %65 : vector<8x8xf32>
    %67 = math.exp %66 : vector<8x8xf32>
    %cst_25 = arith.constant dense<0.000000e+00> : vector<8xf32>
    %68 = vector.multi_reduction <add>, %67, %cst_25 [1] : vector<8x8xf32> to vector<8xf32>
    %69 = vector.shape_cast %68 : vector<8xf32> to vector<8x1xf32>
    %70 = tpu.reciprocal %69 {approx = true} : vector<8x1xf32> -> vector<8x1xf32>
    %71 = vector.broadcast %70 : vector<8x1xf32> to vector<8x8xf32>
    %72 = arith.mulf %67, %71 : vector<8x8xf32>
    %73 = arith.truncf %72 : vector<8x8xf32> to vector<8x8xbf16>
    %cst_26 = arith.constant dense<0.000000e+00> : vector<8x8xf32>
    %74 = tpu.matmul %73, %59, %cst_26 {dimension_numbers = #tpu.dot_dimension_numbers<[1], [0], [0], [1], [0, 0, 1, 1], [], []>} : vector<8x8xbf16>, vector<8x8xbf16>, vector<8x8xf32> -> vector<8x8xf32>
    %75 = vector.extract_strided_slice %3 {offsets = [0, 24], sizes = [8, 8], strides = [1, 1]} : vector<8x32xf32> to vector<8x8xf32>
    %76 = arith.truncf %75 : vector<8x8xf32> to vector<8x8xbf16>
    %77 = vector.extract_strided_slice %5 {offsets = [0, 24], sizes = [8, 8], strides = [1, 1]} : vector<8x32xf32> to vector<8x8xf32>
    %78 = arith.truncf %77 : vector<8x8xf32> to vector<8x8xbf16>
    %79 = vector.extract_strided_slice %7 {offsets = [0, 24], sizes = [8, 8], strides = [1, 1]} : vector<8x32xf32> to vector<8x8xf32>
    %80 = arith.truncf %79 : vector<8x8xf32> to vector<8x8xbf16>
    %cst_27 = arith.constant dense<0.000000e+00> : vector<8x8xf32>
    %81 = tpu.matmul %76, %78, %cst_27 {dimension_numbers = #tpu.dot_dimension_numbers<[1], [1], [0], [0], [0, 0, 1, 0], [], []>} : vector<8x8xbf16>, vector<8x8xbf16>, vector<8x8xf32> -> vector<8x8xf32>
    %cst_28 = arith.constant -1.000000e+10 : f32
    %82 = vector.broadcast %cst_28 : f32 to vector<8x8xf32>
    %83 = arith.select %11, %82, %81 : vector<8x8xi1>, vector<8x8xf32>
    %cst_29 = arith.constant dense<0xFF800000> : vector<8xf32>
    %84 = vector.multi_reduction <maximumf>, %83, %cst_29 [1] : vector<8x8xf32> to vector<8xf32>
    %85 = vector.shape_cast %84 : vector<8xf32> to vector<8x1xf32>
    %86 = vector.broadcast %85 : vector<8x1xf32> to vector<8x8xf32>
    %87 = arith.subf %83, %86 : vector<8x8xf32>
    %88 = math.exp %87 : vector<8x8xf32>
    %cst_30 = arith.constant dense<0.000000e+00> : vector<8xf32>
    %89 = vector.multi_reduction <add>, %88, %cst_30 [1] : vector<8x8xf32> to vector<8xf32>
    %90 = vector.shape_cast %89 : vector<8xf32> to vector<8x1xf32>
    %91 = tpu.reciprocal %90 {approx = true} : vector<8x1xf32> -> vector<8x1xf32>
    %92 = vector.broadcast %91 : vector<8x1xf32> to vector<8x8xf32>
    %93 = arith.mulf %88, %92 : vector<8x8xf32>
    %94 = arith.truncf %93 : vector<8x8xf32> to vector<8x8xbf16>
    %cst_31 = arith.constant dense<0.000000e+00> : vector<8x8xf32>
    %95 = tpu.matmul %94, %80, %cst_31 {dimension_numbers = #tpu.dot_dimension_numbers<[1], [0], [0], [1], [0, 0, 1, 1], [], []>} : vector<8x8xbf16>, vector<8x8xbf16>, vector<8x8xf32> -> vector<8x8xf32>
    %96 = tpu.concatenate %32, %53, %74, %95 in 1 : vector<8x8xf32>, vector<8x8xf32>, vector<8x8xf32>, vector<8x8xf32> -> vector<8x32xf32>
    %c0_32 = arith.constant 0 : index
    %c0_33 = arith.constant 0 : index
    %c0_34 = arith.constant 0 : index
    %97 = vector.load %arg5[%c0_32, %c0_33, %c0_34] : memref<1x8x32xf32, #tpu.memory_space<vmem>>, vector<1x8x32xf32>
    %98 = vector.shape_cast %97 : vector<1x8x32xf32> to vector<8x32xf32>
    %99 = vector.shape_cast %96 : vector<8x32xf32> to vector<1x8x32xf32>
    tpu.vector_store %arg5[%c0_32, %c0_33, %c0_34], %99 {strides = array<i32>} : memref<1x8x32xf32, #tpu.memory_space<vmem>>, vector<1x8x32xf32>,
    return
  }
  func.func @transform_0(%arg0: i32) -> (i32, i32, i32) {
    %c0_i32 = arith.constant 0 : i32
    %c0_i32_0 = arith.constant 0 : i32
    %c0_i32_1 = arith.constant 0 : i32
    return %arg0, %c0_i32, %c0_i32_0 : i32, i32, i32
  }
  func.func @transform_1(%arg0: i32) -> (i32, i32, i32) {
    %c0_i32 = arith.constant 0 : i32
    %c0_i32_0 = arith.constant 0 : i32
    %c0_i32_1 = arith.constant 0 : i32
    return %arg0, %c0_i32, %c0_i32_0 : i32, i32, i32
  }
  func.func @transform_2(%arg0: i32) -> (i32, i32, i32) {
    %c0_i32 = arith.constant 0 : i32
    %c0_i32_0 = arith.constant 0 : i32
    %c0_i32_1 = arith.constant 0 : i32
    return %arg0, %c0_i32, %c0_i32_0 : i32, i32, i32
  }
  func.func @transform_3(%arg0: i32) -> (i32, i32, i32) {
    %c0_i32 = arith.constant 0 : i32
    %c0_i32_0 = arith.constant 0 : i32
    %c0_i32_1 = arith.constant 0 : i32
    return %arg0, %c0_i32, %c0_i32_0 : i32, i32, i32
  }
  func.func @transform_4(%arg0: i32) -> (i32, i32, i32) {
    %c0_i32 = arith.constant 0 : i32
    %c0_i32_0 = arith.constant 0 : i32
    %c0_i32_1 = arith.constant 0 : i32
    return %arg0, %c0_i32, %c0_i32_0 : i32, i32, i32
  }
}

module attributes {stable_mosaic.version = 11 : i64} {
  func.func @_matmul_kernel(%arg0: i32, %arg1: memref<16x32xf32, #tpu.memory_space<vmem>>, %arg2: memref<32x64xbf16, #tpu.memory_space<vmem>>, %arg3: memref<1x64xf32, #tpu.memory_space<vmem>>, %arg4: memref<16x64xf32, #tpu.memory_space<vmem>>) attributes {dimension_semantics = [#tpu.dimension_semantics<parallel>], iteration_bounds = array<i64: 1>, scalar_prefetch = 0 : i64, scratch_operands = 0 : i64, tpu.core_type = #tpu.core_type<tc>, window_params = [{transform_indices = @transform_0, window_bounds = array<i64: 16, 32>}, {pipeline_mode = #tpu.pipeline_mode<synchronous>, transform_indices = @transform_1, window_bounds = array<i64: 32, 64>}, {pipeline_mode = #tpu.pipeline_mode<synchronous>, transform_indices = @transform_2, window_bounds = array<i64: 1, 64>}, {transform_indices = @transform_3, window_bounds = array<i64: 16, 64>}]} {
    %c0 = arith.constant 0 : index
    %c0_0 = arith.constant 0 : index
    %0 = vector.load %arg1[%c0, %c0_0] : memref<16x32xf32, #tpu.memory_space<vmem>>, vector<16x32xf32>
    %1 = arith.truncf %0 : vector<16x32xf32> to vector<16x32xbf16>
    %c0_1 = arith.constant 0 : index
    %c0_2 = arith.constant 0 : index
    %2 = vector.load %arg2[%c0_1, %c0_2] : memref<32x64xbf16, #tpu.memory_space<vmem>>, vector<32x64xbf16>
    %cst = arith.constant dense<0.000000e+00> : vector<16x64xf32>
    %3 = tpu.matmul %1, %2, %cst {dimension_numbers = #tpu.dot_dimension_numbers<[1], [0], [0], [1], [0, 0, 1, 1], [], []>} : vector<16x32xbf16>, vector<32x64xbf16>, vector<16x64xf32> -> vector<16x64xf32>
    %c0_3 = arith.constant 0 : index
    %c0_4 = arith.constant 0 : index
    %4 = vector.load %arg3[%c0_3, %c0_4] : memref<1x64xf32, #tpu.memory_space<vmem>>, vector<1x64xf32>
    %5 = vector.broadcast %4 : vector<1x64xf32> to vector<16x64xf32>
    %6 = arith.addf %3, %5 : vector<16x64xf32>
    %c0_5 = arith.constant 0 : index
    %c0_6 = arith.constant 0 : index
    %7 = vector.load %arg4[%c0_5, %c0_6] : memref<16x64xf32, #tpu.memory_space<vmem>>, vector<16x64xf32>
    tpu.vector_store %arg4[%c0_5, %c0_6], %6 {strides = array<i32>} : memref<16x64xf32, #tpu.memory_space<vmem>>, vector<16x64xf32>,
    return
  }
  func.func @transform_0(%arg0: i32) -> (i32, i32) {
    %c0_i32 = arith.constant 0 : i32
    %c0_i32_0 = arith.constant 0 : i32
    return %arg0, %c0_i32 : i32, i32
  }
  func.func @transform_1(%arg0: i32) -> (i32, i32) {
    %c0_i32 = arith.constant 0 : i32
    %c0_i32_0 = arith.constant 0 : i32
    %c0_i32_1 = arith.constant 0 : i32
    return %c0_i32, %c0_i32_0 : i32, i32
  }
  func.func @transform_2(%arg0: i32) -> (i32, i32) {
    %c0_i32 = arith.constant 0 : i32
    %c0_i32_0 = arith.constant 0 : i32
    %c0_i32_1 = arith.constant 0 : i32
    return %c0_i32, %c0_i32_0 : i32, i32
  }
  func.func @transform_3(%arg0: i32) -> (i32, i32) {
    %c0_i32 = arith.constant 0 : i32
    %c0_i32_0 = arith.constant 0 : i32
    return %arg0, %c0_i32 : i32, i32
  }
}

module attributes {stable_mosaic.version = 11 : i64} {
  func.func @_ln_kernel(%arg0: i32, %arg1: memref<16x32xf32, #tpu.memory_space<vmem>>, %arg2: memref<1x32xf32, #tpu.memory_space<vmem>>, %arg3: memref<1x32xf32, #tpu.memory_space<vmem>>, %arg4: memref<16x32xf32, #tpu.memory_space<vmem>>) attributes {dimension_semantics = [#tpu.dimension_semantics<parallel>], iteration_bounds = array<i64: 1>, scalar_prefetch = 0 : i64, scratch_operands = 0 : i64, tpu.core_type = #tpu.core_type<tc>, window_params = [{transform_indices = @transform_0, window_bounds = array<i64: 16, 32>}, {pipeline_mode = #tpu.pipeline_mode<synchronous>, transform_indices = @transform_1, window_bounds = array<i64: 1, 32>}, {pipeline_mode = #tpu.pipeline_mode<synchronous>, transform_indices = @transform_2, window_bounds = array<i64: 1, 32>}, {transform_indices = @transform_3, window_bounds = array<i64: 16, 32>}]} {
    %c0 = arith.constant 0 : index
    %c0_0 = arith.constant 0 : index
    %0 = vector.load %arg1[%c0, %c0_0] : memref<16x32xf32, #tpu.memory_space<vmem>>, vector<16x32xf32>
    %c0_1 = arith.constant 0 : index
    %c0_2 = arith.constant 0 : index
    %1 = vector.load %arg2[%c0_1, %c0_2] : memref<1x32xf32, #tpu.memory_space<vmem>>, vector<1x32xf32>
    %c0_3 = arith.constant 0 : index
    %c0_4 = arith.constant 0 : index
    %2 = vector.load %arg3[%c0_3, %c0_4] : memref<1x32xf32, #tpu.memory_space<vmem>>, vector<1x32xf32>
    %cst = arith.constant dense<0.000000e+00> : vector<16xf32>
    %3 = vector.multi_reduction <add>, %0, %cst [1] : vector<16x32xf32> to vector<16xf32>
    %4 = vector.shape_cast %3 : vector<16xf32> to vector<16x1xf32>
    %cst_5 = arith.constant 3.200000e+01 : f32
    %5 = vector.broadcast %cst_5 : f32 to vector<16x1xf32>
    %6 = arith.divf %4, %5 : vector<16x1xf32>
    %7 = vector.broadcast %6 : vector<16x1xf32> to vector<16x32xf32>
    %8 = arith.subf %0, %7 : vector<16x32xf32>
    %9 = arith.mulf %8, %8 : vector<16x32xf32>
    %cst_6 = arith.constant dense<0.000000e+00> : vector<16xf32>
    %10 = vector.multi_reduction <add>, %9, %cst_6 [1] : vector<16x32xf32> to vector<16xf32>
    %11 = vector.shape_cast %10 : vector<16xf32> to vector<16x1xf32>
    %cst_7 = arith.constant 3.100000e+01 : f32
    %12 = vector.broadcast %cst_7 : f32 to vector<16x1xf32>
    %13 = arith.divf %11, %12 : vector<16x1xf32>
    %14 = vector.broadcast %1 : vector<1x32xf32> to vector<16x32xf32>
    %15 = arith.mulf %14, %8 : vector<16x32xf32>
    %16 = math.sqrt %13 : vector<16x1xf32>
    %cst_8 = arith.constant 9.99999997E-7 : f32
    %17 = vector.broadcast %cst_8 : f32 to vector<16x1xf32>
    %18 = arith.addf %16, %17 : vector<16x1xf32>
    %19 = vector.broadcast %18 : vector<16x1xf32> to vector<16x32xf32>
    %20 = arith.divf %15, %19 : vector<16x32xf32>
    %21 = vector.broadcast %2 : vector<1x32xf32> to vector<16x32xf32>
    %22 = arith.addf %20, %21 : vector<16x32xf32>
    %c0_9 = arith.constant 0 : index
    %c0_10 = arith.constant 0 : index
    %23 = vector.load %arg4[%c0_9, %c0_10] : memref<16x32xf32, #tpu.memory_space<vmem>>, vector<16x32xf32>
    tpu.vector_store %arg4[%c0_9, %c0_10], %22 {strides = array<i32>} : memref<16x32xf32, #tpu.memory_space<vmem>>, vector<16x32xf32>,
    return
  }
  func.func @transform_0(%arg0: i32) -> (i32, i32) {
    %c0_i32 = arith.constant 0 : i32
    %c0_i32_0 = arith.constant 0 : i32
    return %arg0, %c0_i32 : i32, i32
  }
  func.func @transform_1(%arg0: i32) -> (i32, i32) {
    %c0_i32 = arith.constant 0 : i32
    %c0_i32_0 = arith.constant 0 : i32
    %c0_i32_1 = arith.constant 0 : i32
    return %c0_i32, %c0_i32_0 : i32, i32
  }
  func.func @transform_2(%arg0: i32) -> (i32, i32) {
    %c0_i32 = arith.constant 0 : i32
    %c0_i32_0 = arith.constant 0 : i32
    %c0_i32_1 = arith.constant 0 : i32
    return %c0_i32, %c0_i32_0 : i32, i32
  }
  func.func @transform_3(%arg0: i32) -> (i32, i32) {
    %c0_i32 = arith.constant 0 : i32
    %c0_i32_0 = arith.constant 0 : i32
    return %arg0, %c0_i32 : i32, i32
  }
}

module attributes {stable_mosaic.version = 11 : i64} {
  func.func @_ln_ffn_res_kernel(%arg0: i32, %arg1: memref<16x32xf32, #tpu.memory_space<vmem>>, %arg2: memref<1x32xf32, #tpu.memory_space<vmem>>, %arg3: memref<1x32xf32, #tpu.memory_space<vmem>>, %arg4: memref<32x64xbf16, #tpu.memory_space<vmem>>, %arg5: memref<1x64xf32, #tpu.memory_space<vmem>>, %arg6: memref<64x32xbf16, #tpu.memory_space<vmem>>, %arg7: memref<1x32xf32, #tpu.memory_space<vmem>>, %arg8: memref<16x32xf32, #tpu.memory_space<vmem>>) attributes {dimension_semantics = [#tpu.dimension_semantics<parallel>], iteration_bounds = array<i64: 1>, scalar_prefetch = 0 : i64, scratch_operands = 0 : i64, tpu.core_type = #tpu.core_type<tc>, window_params = [{transform_indices = @transform_0, window_bounds = array<i64: 16, 32>}, {pipeline_mode = #tpu.pipeline_mode<synchronous>, transform_indices = @transform_1, window_bounds = array<i64: 1, 32>}, {pipeline_mode = #tpu.pipeline_mode<synchronous>, transform_indices = @transform_2, window_bounds = array<i64: 1, 32>}, {pipeline_mode = #tpu.pipeline_mode<synchronous>, transform_indices = @transform_3, window_bounds = array<i64: 32, 64>}, {pipeline_mode = #tpu.pipeline_mode<synchronous>, transform_indices = @transform_4, window_bounds = array<i64: 1, 64>}, {pipeline_mode = #tpu.pipeline_mode<synchronous>, transform_indices = @transform_5, window_bounds = array<i64: 64, 32>}, {pipeline_mode = #tpu.pipeline_mode<synchronous>, transform_indices = @transform_6, window_bounds = array<i64: 1, 32>}, {transform_indices = @transform_7, window_bounds = array<i64: 16, 32>}]} {
    %c0 = arith.constant 0 : index
    %c0_0 = arith.constant 0 : index
    %0 = vector.load %arg1[%c0, %c0_0] : memref<16x32xf32, #tpu.memory_space<vmem>>, vector<16x32xf32>
    %c0_1 = arith.constant 0 : index
    %c0_2 = arith.constant 0 : index
    %1 = vector.load %arg2[%c0_1, %c0_2] : memref<1x32xf32, #tpu.memory_space<vmem>>, vector<1x32xf32>
    %c0_3 = arith.constant 0 : index
    %c0_4 = arith.constant 0 : index
    %2 = vector.load %arg3[%c0_3, %c0_4] : memref<1x32xf32, #tpu.memory_space<vmem>>, vector<1x32xf32>
    %cst = arith.constant dense<0.000000e+00> : vector<16xf32>
    %3 = vector.multi_reduction <add>, %0, %cst [1] : vector<16x32xf32> to vector<16xf32>
    %4 = vector.shape_cast %3 : vector<16xf32> to vector<16x1xf32>
    %cst_5 = arith.constant 3.200000e+01 : f32
    %5 = vector.broadcast %cst_5 : f32 to vector<16x1xf32>
    %6 = arith.divf %4, %5 : vector<16x1xf32>
    %7 = vector.broadcast %6 : vector<16x1xf32> to vector<16x32xf32>
    %8 = arith.subf %0, %7 : vector<16x32xf32>
    %9 = arith.mulf %8, %8 : vector<16x32xf32>
    %cst_6 = arith.constant dense<0.000000e+00> : vector<16xf32>
    %10 = vector.multi_reduction <add>, %9, %cst_6 [1] : vector<16x32xf32> to vector<16xf32>
    %11 = vector.shape_cast %10 : vector<16xf32> to vector<16x1xf32>
    %cst_7 = arith.constant 3.100000e+01 : f32
    %12 = vector.broadcast %cst_7 : f32 to vector<16x1xf32>
    %13 = arith.divf %11, %12 : vector<16x1xf32>
    %14 = vector.broadcast %1 : vector<1x32xf32> to vector<16x32xf32>
    %15 = arith.mulf %14, %8 : vector<16x32xf32>
    %16 = math.sqrt %13 : vector<16x1xf32>
    %cst_8 = arith.constant 9.99999997E-7 : f32
    %17 = vector.broadcast %cst_8 : f32 to vector<16x1xf32>
    %18 = arith.addf %16, %17 : vector<16x1xf32>
    %19 = vector.broadcast %18 : vector<16x1xf32> to vector<16x32xf32>
    %20 = arith.divf %15, %19 : vector<16x32xf32>
    %21 = vector.broadcast %2 : vector<1x32xf32> to vector<16x32xf32>
    %22 = arith.addf %20, %21 : vector<16x32xf32>
    %23 = arith.truncf %22 : vector<16x32xf32> to vector<16x32xbf16>
    %c0_9 = arith.constant 0 : index
    %c0_10 = arith.constant 0 : index
    %24 = vector.load %arg4[%c0_9, %c0_10] : memref<32x64xbf16, #tpu.memory_space<vmem>>, vector<32x64xbf16>
    %cst_11 = arith.constant dense<0.000000e+00> : vector<16x64xf32>
    %25 = tpu.matmul %23, %24, %cst_11 {dimension_numbers = #tpu.dot_dimension_numbers<[1], [0], [0], [1], [0, 0, 1, 1], [], []>} : vector<16x32xbf16>, vector<32x64xbf16>, vector<16x64xf32> -> vector<16x64xf32>
    %c0_12 = arith.constant 0 : index
    %c0_13 = arith.constant 0 : index
    %26 = vector.load %arg5[%c0_12, %c0_13] : memref<1x64xf32, #tpu.memory_space<vmem>>, vector<1x64xf32>
    %27 = vector.broadcast %26 : vector<1x64xf32> to vector<16x64xf32>
    %28 = arith.addf %25, %27 : vector<16x64xf32>
    %cst_14 = arith.constant 0.000000e+00 : f32
    %29 = vector.broadcast %cst_14 : f32 to vector<16x64xf32>
    %30 = arith.maximumf %28, %29 : vector<16x64xf32>
    %31 = arith.truncf %30 : vector<16x64xf32> to vector<16x64xbf16>
    %c0_15 = arith.constant 0 : index
    %c0_16 = arith.constant 0 : index
    %32 = vector.load %arg6[%c0_15, %c0_16] : memref<64x32xbf16, #tpu.memory_space<vmem>>, vector<64x32xbf16>
    %cst_17 = arith.constant dense<0.000000e+00> : vector<16x32xf32>
    %33 = tpu.matmul %31, %32, %cst_17 {dimension_numbers = #tpu.dot_dimension_numbers<[1], [0], [0], [1], [0, 0, 1, 1], [], []>} : vector<16x64xbf16>, vector<64x32xbf16>, vector<16x32xf32> -> vector<16x32xf32>
    %c0_18 = arith.constant 0 : index
    %c0_19 = arith.constant 0 : index
    %34 = vector.load %arg7[%c0_18, %c0_19] : memref<1x32xf32, #tpu.memory_space<vmem>>, vector<1x32xf32>
    %35 = vector.broadcast %34 : vector<1x32xf32> to vector<16x32xf32>
    %36 = arith.addf %33, %35 : vector<16x32xf32>
    %37 = arith.addf %36, %0 : vector<16x32xf32>
    %c0_20 = arith.constant 0 : index
    %c0_21 = arith.constant 0 : index
    %38 = vector.load %arg8[%c0_20, %c0_21] : memref<16x32xf32, #tpu.memory_space<vmem>>, vector<16x32xf32>
    tpu.vector_store %arg8[%c0_20, %c0_21], %37 {strides = array<i32>} : memref<16x32xf32, #tpu.memory_space<vmem>>, vector<16x32xf32>,
    return
  }
  func.func @transform_0(%arg0: i32) -> (i32, i32) {
    %c0_i32 = arith.constant 0 : i32
    %c0_i32_0 = arith.constant 0 : i32
    return %arg0, %c0_i32 : i32, i32
  }
  func.func @transform_1(%arg0: i32) -> (i32, i32) {
    %c0_i32 = arith.constant 0 : i32
    %c0_i32_0 = arith.constant 0 : i32
    %c0_i32_1 = arith.constant 0 : i32
    return %c0_i32, %c0_i32_0 : i32, i32
  }
  func.func @transform_2(%arg0: i32) -> (i32, i32) {
    %c0_i32 = arith.constant 0 : i32
    %c0_i32_0 = arith.constant 0 : i32
    %c0_i32_1 = arith.constant 0 : i32
    return %c0_i32, %c0_i32_0 : i32, i32
  }
  func.func @transform_3(%arg0: i32) -> (i32, i32) {
    %c0_i32 = arith.constant 0 : i32
    %c0_i32_0 = arith.constant 0 : i32
    %c0_i32_1 = arith.constant 0 : i32
    return %c0_i32, %c0_i32_0 : i32, i32
  }
  func.func @transform_4(%arg0: i32) -> (i32, i32) {
    %c0_i32 = arith.constant 0 : i32
    %c0_i32_0 = arith.constant 0 : i32
    %c0_i32_1 = arith.constant 0 : i32
    return %c0_i32, %c0_i32_0 : i32, i32
  }
  func.func @transform_5(%arg0: i32) -> (i32, i32) {
    %c0_i32 = arith.constant 0 : i32
    %c0_i32_0 = arith.constant 0 : i32
    %c0_i32_1 = arith.constant 0 : i32
    return %c0_i32, %c0_i32_0 : i32, i32
  }
  func.func @transform_6(%arg0: i32) -> (i32, i32) {
    %c0_i32 = arith.constant 0 : i32
    %c0_i32_0 = arith.constant 0 : i32
    %c0_i32_1 = arith.constant 0 : i32
    return %c0_i32, %c0_i32_0 : i32, i32
  }
  func.func @transform_7(%arg0: i32) -> (i32, i32) {
    %c0_i32 = arith.constant 0 : i32
    %c0_i32_0 = arith.constant 0 : i32
    return %arg0, %c0_i32 : i32, i32
  }
}

</mosaic_0001>

<bundles_post_ra>
// kernel: decoder_forward.17
= control target key start
LH: loop header
LB: loop body
LE: loop exit
PB: predicated region body
PF: predicated region fallthrough
CT: control target
= control target key end

     0   :  { %vm25_vm0 = vcmask 261120   ;;  %v188_v14 = vmov 0.0   ;;  %vm189_vm1 = vmmov 0   ;;  %vm152_vm6 = vcmask 785408   ;;  %s252_s0 = inlined_call_operand.vmem [shape: f32[16,32], index: 0, kind: input, shape index: {}]   ;;  %s253_s3 = inlined_call_operand.vmem [shape: bf16[32,96], index: 3, kind: input, shape index: {}]   ;;  %s254_s1 = inlined_call_operand.vmem [shape: f32[1,32], index: 1, kind: input, shape index: {}]   ;;  %s255_s2 = inlined_call_operand.vmem [shape: f32[1,32], index: 2, kind: input, shape index: {}]   ;;  %s256_s4 = inlined_call_operand.vmem [shape: f32[1,96], index: 4, kind: input, shape index: {}]   ;;  %s257_s5 = inlined_call_operand.vmem [shape: f32[16,96], index: 5, kind: output, shape index: {}]  }
   0x1   :  { %v21_v0 = vld [vmem:[%s252_s0] sm:$0xff]  ;;  %v22_v1 = vld [vmem:[%s252_s0 + $0x8] sm:$0xff]  ;;  %168 = vmatprep.subr.bf16.mxu0 %v188_v14  ;;  %172 = vmatprep.mubr.msk.bf16.mxu0 %vm189_vm1, %v188_v14 }
   0x2   :  { %v26_v2 = vsel %vm25_vm0, %v21_v0, 0.0  ;;  %v29_v3 = vsel %vm25_vm0, %v22_v1, 0.0  ;;  %v178_v15 = vld [vmem:[%s253_s3] sm:$0xff]   ;;  %v179_v16 = vld [vmem:[%s253_s3 + $0x8] sm:$0xff]  }
   0x3   :  { %27 = vadd.xlane.f32.xlu0 %v26_v2  ;;  %169 = vmatpush3.bf16.msra.mxu0 %v178_v15  ;;  %v159_v33 = vld [vmem:[%s254_s1] ss:$0 sm:$0xff] }
   0x4   :  { %170 = vmatprep.subr.bf16.mxu0 %v188_v14  ;;  %v160_v39 = vld [vmem:[%s255_s2] ss:$0 sm:$0xff] }
   0x5   :  { %v161_v44 = vld [vmem:[%s256_s4] ss:$0 sm:$0xff] }
   0x7   :  { %30 = vadd.xlane.f32.xlu0 %v29_v3  ;;  %171 = vmatpush3.bf16.msra.mxu0 %v179_v16 }
  0x90   :  { %v28_v4 = vpop.xlane.xlu0 %27 }
  0x91   :  { %v33_v5 = vmul.f32 0.03125, %v28_v4 }
  0x93   :  { %v35_v6 = vsub.f32 %v21_v0, %v33_v5 }
  0x94   :  { %v31_v7 = vpop.xlane.xlu0 %30 }
  0x95   :  { %v34_v8 = vmul.f32 0.03125, %v31_v7  ;;  %v37_v9 = vmul.f32 %v35_v6, %v35_v6  ;;  %v54_v35 = vmul.f32 %v159_v33, %v35_v6 }
  0x97   :  { %v36_v10 = vsub.f32 %v22_v1, %v34_v8  ;;  %v39_v11 = vsel %vm25_vm0, %v37_v9, 0.0 }
  0x98   :  { %40 = vadd.xlane.f32.xlu1 %v39_v11 }
  0x99   :  { %v38_v12 = vmul.f32 %v36_v10, %v36_v10  ;;  %v55_v36 = vmul.f32 %v159_v33, %v36_v10 }
  0x9b   :  { %v42_v13 = vsel %vm25_vm0, %v38_v12, 0.0 }
  0x9c   :  { %43 = vadd.xlane.f32.xlu1 %v42_v13 }
 0x125   :  { %v41_v17 = vpop.xlane.xlu1 %40 }
 0x126   :  { %v46_v18 = vmul.f32 0.032258064, %v41_v17 }
 0x128   :  { %180 = vrsqrt.f32 %v46_v18  ;;  %vm58_vm2 = vcmp.eq.f32.partialorder %v46_v18, inf  ;;  %v61_v23 = vand.u32 2147483648, %v46_v18  ;;  %vm60_vm3 = vcmp.eq.f32.partialorder %v46_v18, 0.0 }
 0x129   :  { %v44_v19 = vpop.xlane.xlu1 %43 }
 0x12a   :  { %v47_v20 = vmul.f32 0.032258064, %v44_v19 }
 0x12c   :  { %182 = vrsqrt.f32 %v47_v20  ;;  %vm65_vm4 = vcmp.eq.f32.partialorder %v47_v20, inf  ;;  %v68_v29 = vand.u32 2147483648, %v47_v20  ;;  %vm67_vm5 = vcmp.eq.f32.partialorder %v47_v20, 0.0 }
 0x132   :  { %v181_v21 = vpop.eup %180 }
 0x133   :  { %v57_v22 = vmul.f32 %v181_v21, %v46_v18 }
 0x135   :  { %v59_v24 = vsel %vm58_vm2, %v46_v18, %v57_v22 }
 0x136   :  { %v183_v25 = vpop.eup %182  ;;  %v62_v26 = vsel %vm60_vm3, %v61_v23, %v59_v24 }
 0x137   :  { %v70_v27 = vadd.f32 1e-06, %v62_v26  ;;  %v64_v28 = vmul.f32 %v183_v25, %v47_v20 }
 0x139   :  { %184 = vrcp.f32 %v70_v27  ;;  %v66_v30 = vsel %vm65_vm4, %v47_v20, %v64_v28 }
 0x13a   :  { %v69_v31 = vsel %vm67_vm5, %v68_v29, %v66_v30 }
 0x13b   :  { %v71_v32 = vadd.f32 1e-06, %v69_v31 }
 0x13d   :  { %186 = vrcp.f32 %v71_v32 }
 0x143   :  { %v185_v34 = vpop.eup %184 }
 0x144   :  { %v73_v37 = vmul.f32 %v185_v34, %v54_v35 }
 0x146   :  { %v82_v41 = vadd.f32 %v160_v39, %v73_v37 }
 0x147   :  { %v187_v38 = vpop.eup %186 }
 0x148   :  { %v75_v40 = vmul.f32 %v187_v38, %v55_v36 }
 0x14a   :  { %v83_v42 = vadd.f32 %v160_v39, %v75_v40 }
 0x14c   :  { %v84_v43 = vpack.c.bf16 %v83_v42, %v82_v41 }
 0x14e   :  { %173 = vmatmul.mubr.msk.bf16.vlgmr.msra.gmra.mrb[0].mxu0 %vm25_vm0, %v84_v43 }
 0x221   :  { %v145_v45 = vpop.f32.mrb[0].mxu0 }
 0x222   :  { %v146_v46 = vadd.f32 %v161_v44, %v145_v45  ;;  %v174_v47 = vpop.f32.mrb[1].mxu0 }
 0x223   :  { %v148_v48 = vpop.f32.mrb[2].mxu0 }
 0x224   :  { %153 = vst.msk [vmem:[%s257_s5] sm:$0xff] %vm152_vm6, %v146_v46  ;;  %v149_v49 = vadd.f32 %v161_v44, %v148_v48  ;;  %v175_v50 = vpop.f32.mrb[3].mxu0 }
 0x226   :  { %154 = vst.msk [vmem:[%s257_s5 + $0x8] sm:$0xff] %vm152_vm6, %v149_v49 }

// kernel: decoder_forward.20
= control target key start
LH: loop header
LB: loop body
LE: loop exit
PB: predicated region body
PF: predicated region fallthrough
CT: control target
= control target key end

     0   :  { %vm25_vm0 = vcmask 261120   ;;  %v187_v14 = vmov 0.0   ;;  %vm188_vm1 = vmmov 0   ;;  %s253_s0 = inlined_call_operand.vmem [shape: f32[16,32], index: 0, kind: input, shape index: {}]   ;;  %s254_s3 = inlined_call_operand.vmem [shape: bf16[32,32], index: 3, kind: input, shape index: {}]   ;;  %s255_s1 = inlined_call_operand.vmem [shape: f32[1,32], index: 1, kind: input, shape index: {}]   ;;  %s256_s2 = inlined_call_operand.vmem [shape: f32[1,32], index: 2, kind: input, shape index: {}]   ;;  %s257_s4 = inlined_call_operand.vmem [shape: f32[1,32], index: 4, kind: input, shape index: {}]   ;;  %s258_s5 = inlined_call_operand.vmem [shape: f32[16,32], index: 5, kind: output, shape index: {}]  }
   0x1   :  { %v21_v0 = vld [vmem:[%s253_s0] sm:$0xff]  ;;  %v22_v1 = vld [vmem:[%s253_s0 + $0x8] sm:$0xff]  ;;  %167 = vmatprep.subr.bf16.mxu0 %v187_v14  ;;  %171 = vmatprep.mubr.msk.bf16.mxu0 %vm188_vm1, %v187_v14 }
   0x2   :  { %v26_v2 = vsel %vm25_vm0, %v21_v0, 0.0  ;;  %v29_v3 = vsel %vm25_vm0, %v22_v1, 0.0  ;;  %v177_v15 = vld [vmem:[%s254_s3] sm:$0xff]   ;;  %v178_v16 = vld [vmem:[%s254_s3 + $0x8] sm:$0xff]  }
   0x3   :  { %27 = vadd.xlane.f32.xlu0 %v26_v2  ;;  %168 = vmatpush3.bf16.msra.mxu0 %v177_v15  ;;  %v158_v33 = vld [vmem:[%s255_s1] ss:$0 sm:$0xff] }
   0x4   :  { %169 = vmatprep.subr.bf16.mxu0 %v187_v14  ;;  %v159_v39 = vld [vmem:[%s256_s2] ss:$0 sm:$0xff] }
   0x5   :  { %v160_v44 = vld [vmem:[%s257_s4] ss:$0 sm:$0xff] }
   0x7   :  { %30 = vadd.xlane.f32.xlu0 %v29_v3  ;;  %170 = vmatpush3.bf16.msra.mxu0 %v178_v16 }
  0x90   :  { %v28_v4 = vpop.xlane.xlu0 %27 }
  0x91   :  { %v33_v5 = vmul.f32 0.03125, %v28_v4 }
  0x93   :  { %v35_v6 = vsub.f32 %v21_v0, %v33_v5 }
  0x94   :  { %v31_v7 = vpop.xlane.xlu0 %30 }
  0x95   :  { %v34_v8 = vmul.f32 0.03125, %v31_v7  ;;  %v37_v9 = vmul.f32 %v35_v6, %v35_v6  ;;  %v54_v35 = vmul.f32 %v158_v33, %v35_v6 }
  0x97   :  { %v36_v10 = vsub.f32 %v22_v1, %v34_v8  ;;  %v39_v11 = vsel %vm25_vm0, %v37_v9, 0.0 }
  0x98   :  { %40 = vadd.xlane.f32.xlu1 %v39_v11 }
  0x99   :  { %v38_v12 = vmul.f32 %v36_v10, %v36_v10  ;;  %v55_v36 = vmul.f32 %v158_v33, %v36_v10 }
  0x9b   :  { %v42_v13 = vsel %vm25_vm0, %v38_v12, 0.0 }
  0x9c   :  { %43 = vadd.xlane.f32.xlu1 %v42_v13 }
 0x125   :  { %v41_v17 = vpop.xlane.xlu1 %40 }
 0x126   :  { %v46_v18 = vmul.f32 0.032258064, %v41_v17 }
 0x128   :  { %179 = vrsqrt.f32 %v46_v18  ;;  %vm58_vm2 = vcmp.eq.f32.partialorder %v46_v18, inf  ;;  %v61_v23 = vand.u32 2147483648, %v46_v18  ;;  %vm60_vm3 = vcmp.eq.f32.partialorder %v46_v18, 0.0 }
 0x129   :  { %v44_v19 = vpop.xlane.xlu1 %43 }
 0x12a   :  { %v47_v20 = vmul.f32 0.032258064, %v44_v19 }
 0x12c   :  { %181 = vrsqrt.f32 %v47_v20  ;;  %vm65_vm4 = vcmp.eq.f32.partialorder %v47_v20, inf  ;;  %v68_v29 = vand.u32 2147483648, %v47_v20  ;;  %vm67_vm5 = vcmp.eq.f32.partialorder %v47_v20, 0.0 }
 0x132   :  { %v180_v21 = vpop.eup %179 }
 0x133   :  { %v57_v22 = vmul.f32 %v180_v21, %v46_v18 }
 0x135   :  { %v59_v24 = vsel %vm58_vm2, %v46_v18, %v57_v22 }
 0x136   :  { %v182_v25 = vpop.eup %181  ;;  %v62_v26 = vsel %vm60_vm3, %v61_v23, %v59_v24 }
 0x137   :  { %v70_v27 = vadd.f32 1e-06, %v62_v26  ;;  %v64_v28 = vmul.f32 %v182_v25, %v47_v20 }
 0x139   :  { %183 = vrcp.f32 %v70_v27  ;;  %v66_v30 = vsel %vm65_vm4, %v47_v20, %v64_v28 }
 0x13a   :  { %v69_v31 = vsel %vm67_vm5, %v68_v29, %v66_v30 }
 0x13b   :  { %v71_v32 = vadd.f32 1e-06, %v69_v31 }
 0x13d   :  { %185 = vrcp.f32 %v71_v32 }
 0x143   :  { %v184_v34 = vpop.eup %183 }
 0x144   :  { %v73_v37 = vmul.f32 %v184_v34, %v54_v35 }
 0x146   :  { %v82_v41 = vadd.f32 %v159_v39, %v73_v37 }
 0x147   :  { %v186_v38 = vpop.eup %185 }
 0x148   :  { %v75_v40 = vmul.f32 %v186_v38, %v55_v36 }
 0x14a   :  { %v83_v42 = vadd.f32 %v159_v39, %v75_v40 }
 0x14c   :  { %v84_v43 = vpack.c.bf16 %v83_v42, %v82_v41 }
 0x14e   :  { %172 = vmatmul.mubr.msk.bf16.vlgmr.msra.gmra.mrb[0].mxu0 %vm25_vm0, %v84_v43 }
 0x221   :  { %v145_v45 = vpop.f32.mrb[0].mxu0 }
 0x222   :  { %v146_v46 = vadd.f32 %v160_v44, %v145_v45  ;;  %v173_v47 = vpop.f32.mrb[1].mxu0 }
 0x223   :  { %v148_v48 = vpop.f32.mrb[2].mxu0 }
 0x224   :  { %152 = vst.msk [vmem:[%s258_s5] sm:$0xff] %vm25_vm0, %v146_v46  ;;  %v149_v49 = vadd.f32 %v160_v44, %v148_v48  ;;  %v174_v50 = vpop.f32.mrb[3].mxu0 }
 0x226   :  { %153 = vst.msk [vmem:[%s258_s5 + $0x8] sm:$0xff] %vm25_vm0, %v149_v49 }

// kernel: decoder_forward.19
= control target key start
LH: loop header
LB: loop body
LE: loop exit
PB: predicated region body
PF: predicated region fallthrough
CT: control target
= control target key end

     0   :  { %v118_v0 = vmov 0.0   ;;  %vm119_vm0 = vmmov 0   ;;  %vm44_vm1 = vcmask 261120   ;;  %s175_s1 = inlined_call_operand.vmem [shape: bf16[32,32], index: 1, kind: input, shape index: {}]   ;;  %s176_s0 = inlined_call_operand.vmem [shape: f32[16,32], index: 0, kind: input, shape index: {}]   ;;  %s177_s2 = inlined_call_operand.vmem [shape: f32[1,32], index: 2, kind: input, shape index: {}]   ;;  %s178_s3 = inlined_call_operand.vmem [shape: f32[16,32], index: 3, kind: input, shape index: {}]   ;;  %s179_s4 = inlined_call_operand.vmem [shape: f32[16,32], index: 4, kind: output, shape index: {}]  }
   0x1   :  { %106 = vmatprep.subr.bf16.mxu0 %v118_v0  ;;  %v116_v1 = vld [vmem:[%s175_s1] sm:$0xff]   ;;  %110 = vmatprep.mubr.msk.bf16.mxu0 %vm119_vm0, %v118_v0  ;;  %v117_v2 = vld [vmem:[%s175_s1 + $0x8] sm:$0xff]  }
   0x2   :  { %107 = vmatpush3.bf16.msra.mxu0 %v116_v1  ;;  %v18_v3 = vld [vmem:[%s176_s0] sm:$0xff]  ;;  %v19_v4 = vld [vmem:[%s176_s0 + $0x8] sm:$0xff] }
   0x3   :  { %108 = vmatprep.subr.bf16.mxu0 %v118_v0  ;;  %v20_v5 = vpack.c.bf16 %v19_v4, %v18_v3  ;;  %v99_v6 = vld [vmem:[%s177_s2] ss:$0 sm:$0xff]  ;;  %v90_v12 = vld [vmem:[%s178_s3 + $0x8] sm:$0xff] }
   0x4   :  { %v89_v8 = vld [vmem:[%s178_s3] sm:$0xff] }
   0x6   :  { %109 = vmatpush3.bf16.msra.mxu0 %v117_v2 }
   0x9   :  { %111 = vmatmul.mubr.msk.bf16.vlgmr.msra.gmra.mrb[0].mxu0 %vm44_vm1, %v20_v5 }
  0xdc   :  { %v82_v7 = vpop.f32.mrb[0].mxu0 }
  0xdd   :  { %v83_v9 = vadd.f32 %v99_v6, %v82_v7  ;;  %v112_v10 = vpop.f32.mrb[1].mxu0 }
  0xde   :  { %v85_v11 = vpop.f32.mrb[2].mxu0 }
  0xdf   :  { %v91_v13 = vadd.f32 %v89_v8, %v83_v9  ;;  %v86_v14 = vadd.f32 %v99_v6, %v85_v11  ;;  %v113_v15 = vpop.f32.mrb[3].mxu0 }
  0xe1   :  { %93 = vst.msk [vmem:[%s179_s4] sm:$0xff] %vm44_vm1, %v91_v13  ;;  %v92_v16 = vadd.f32 %v90_v12, %v86_v14 }
  0xe3   :  { %94 = vst.msk [vmem:[%s179_s4 + $0x8] sm:$0xff] %vm44_vm1, %v92_v16 }

// kernel: decoder_forward.18
= control target key start
LH: loop header
LB: loop body
LE: loop exit
PB: predicated region body
PF: predicated region fallthrough
CT: control target
= control target key end

     0   :  { %s962_s15 = smov 0   ;;  %s1073_s0 = inlined_call_operand.vmem [shape: f32[2,8,32], index: 0, kind: input, shape index: {}]   ;;  %s1074_s1 = inlined_call_operand.vmem [shape: f32[2,8,32], index: 1, kind: input, shape index: {}]   ;;  %s1075_s2 = inlined_call_operand.vmem [shape: f32[2,8,32], index: 2, kind: input, shape index: {}]   ;;  %s1076_s3 = inlined_call_operand.vmem [shape: f32[2,8,8], index: 3, kind: input, shape index: {}]   ;;  %s1077_s4 = inlined_call_operand.vmem [shape: f32[2,8,32], index: 4, kind: output, shape index: {}]  }
   0x1 LB: > { %s805_s16 = sadd.s32 4294967295, %s927_s15   ;;  %p809_p0 = scmp.ge.s32.totalorder %s927_s15, 1  ;;  %s927_s15 = sphi %s962_s15, %s14_s15  }
   0x2   : > { %p188_p1 = scmp.lt.s32.totalorder %s927_s15, 3 }
   0x4   : > { %p189_p2 = pnand %p809_p0, %p188_p1 }
   0x5   : > { %p224_p3 = scmp.lt.s32.totalorder (!%p189_p2), %s805_s16, 1  ;;  %v929_v0 = vmov (!%p189_p2), 0.0   ;;  %vm930_vm0 = vmmov (!%p189_p2), 0   ;;  %vm254_vm1 = vcmask (!%p189_p2), 64512   ;;  %s931_s27 = smov (!%p189_p2), 120   ;;  %vm317_vm3 = vcmask (!%p189_p2), 1043456  }
   0x6   : > { %192 = sbr.rel (%p189_p2) target bundleno = 1475 (0x5c3), region = 36  ;;  %841 = vmatprep.subr.bf16.mxu0 (!%p189_p2), %v929_v0  ;;  %843 = vmatprep.mubr.msk.bf16.mxu0 (!%p189_p2), %vm930_vm0, %v929_v0  ;;  %s932_s28 = smov (!%p189_p2), 112   ;;  %vm710_vm4 = vcmask (!%p189_p2), 130048   ;;  %vm712_vm5 = vcmask (!%p189_p2), 195584   ;;  %vm714_vm6 = vcmask (!%p189_p2), 261120  }
   0x7   : > { %847 = vmatprep.subr.bf16.mxu1 (!%p189_p2), %v929_v0  ;;  %849 = vmatprep.mubr.msk.bf16.mxu1 (!%p189_p2), %vm930_vm0, %v929_v0  ;;  %s933_s29 = smov (!%p189_p2), 104   ;;  %s934_s7 = smov (!%p189_p2), 8  }
   0x8   : > { %s935_s8 = smov (!%p189_p2), 16   ;;  %s936_s9 = smov (!%p189_p2), 24  }
   0xd   : > { %s1079_s16 = smov (!%p224_p3, %s805_s16), 1 }
   0xe   : > { %s976_s17 = sshll.u32 %s1079_s16, 3 }
   0xf   : > { %s231_s20 = scalar_lea.vmem %s1074_s1, %s976_s17  ;;  %s227_s23 = scalar_lea.vmem %s1073_s0, %s976_s17 }
  0x10   : > { %v247_v1 = vld [vmem:[%s231_s20] sm:$0xff]  ;;  %s239_s26 = scalar_lea.vmem %s1076_s3, %s976_s17  ;;  %s235_s6 = scalar_lea.vmem %s1075_s2, %s976_s17 }
  0x11   : > { %v245_v2 = vld [vmem:[%s227_s23] sm:$0xff]  ;;  %v252_v3 = vpack.c.bf16 %v247_v1, %v247_v1  ;;  %s243_s12 = scalar_lea.vmem %s1077_s4, %s976_s17 }
  0x12   : > { %v246_v5 = vmul.f32 0.35355338, %v245_v2  ;;  %v995_v7 = vld [vmem:[%s239_s26] sm:$0xff] }
  0x13   : > { %v259_v4 = vsel %vm254_vm1, %v252_v3, 0  ;;  %vm250_vm2 = vcmp.eq.f32.partialorder %v995_v7, 0.0  ;;  %365 = vrot.lane.b32.xlu1 %v252_v3, %s931_s27  ;;  %v248_v19 = vld [vmem:[%s235_s6] sm:$0xff] }
  0x14   : > { %842 = vmatpush3.bf16.xpose.msra.mxu0 %v259_v4  ;;  %v251_v6 = vpack.c.bf16 %v246_v5, %v246_v5  ;;  %v1011_v20 = vpack.c.bf16 %v248_v19, %v248_v19 }
  0x15   : > { %859 = vmatprep.subr.bf16.mxu0 %v929_v0 }
  0x16   : > { %v319_v21 = vsel %vm317_vm3, %v1011_v20, 0 }
  0x17   : > { %362 = vrot.lane.b32.xlu1 %v251_v6, %s931_s27  ;;  %848 = vmatpush3.bf16.msra.mxu1 %v319_v21 }
  0x18   : > { %853 = vmatprep.subr.bf16.mxu1 %v929_v0 }
  0x1b   : > { %844 = vmatmul.mubr.msk.bf16.vlgmr.msra.gmra.mrb[0].mxu0 %vm254_vm1, %v251_v6  ;;  %475 = vrot.lane.b32.xlu1 %v251_v6, %s932_s28 }
  0x1c   : > { %861 = vmatprep.mubr.msk.bf16.mxu0 %vm930_vm0, %v929_v0 }
  0x1f   : > { %588 = vrot.lane.b32.xlu1 %v252_v3, %s933_s29 }
  0x23   : > { %586 = vrot.lane.b32.xlu1 %v251_v6, %s933_s29 }
  0x85   : > { %v366_v24 = vpop.permute.xlu1 %365 }
  0x86   : > { %v371_v26 = vsel %vm254_vm1, %v366_v24, 0 }
  0x89   : > { %v363_v28 = vpop.permute.xlu1 %362 }
  0x8d   : > { %v476_v30 = vpop.permute.xlu1 %475 }
  0x91   : > { %v589_v32 = vpop.permute.xlu1 %588 }
  0x92   : > { %v594_v33 = vsel %vm254_vm1, %v589_v32, 0 }
  0x95   : > { %v587_v34 = vpop.permute.xlu1 %586 }
  0xee   : > { %v295_v8 = vpop.f32.mrb[0].mxu0 }
  0xef   : > { %v301_v9 = vsel %vm250_vm2, -1e+10, %v295_v8  ;;  %v845_v10 = vpop.f32.mrb[1].mxu0 }
  0xf0   : > { %v298_v11 = vpop.f32.mrb[2].mxu0  ;;  %v302_v12 = vsel %vm254_vm1, %v301_v9, -inf }
  0xf1   : > { %303 = vmax.xlane.f32.xlu0 %v302_v12  ;;  %v846_v13 = vpop.f32.mrb[3].mxu0 }
 0x17e   : > { %v304_v14 = vpop.xlane.xlu0 %303 }
 0x17f   : > { %v305_v15 = vsub.f32 %v301_v9, %v304_v14 }
 0x181   : > { %v306_v16 = vmul.f32 1.442695, %v305_v15 }
 0x183   : > { %905 = vpow2.f32 %v306_v16 }
 0x18d   : > { %v906_v17 = vpop.eup %905 }
 0x18e   : > { %v308_v18 = vsel %vm254_vm1, %v906_v17, 0.0 }
 0x18f   : > { %309 = vadd.xlane.f32.xlu0 %v308_v18 }
 0x1a5   : > { %477 = vrot.lane.b32.xlu0 %v252_v3, %s932_s28 }
 0x21c   : > { %v310_v22 = vpop.xlane.xlu0 %309 }
 0x21d   : > { %907 = vrcp.f32 %v310_v22 }
 0x220   : > { %v478_v29 = vpop.permute.xlu0 %477 }
 0x221   : > { %v483_v31 = vsel %vm254_vm1, %v478_v29, 0 }
 0x227   : > { %v908_v23 = vpop.eup %907 }
 0x228   : > { %v312_v25 = vmul.f32 %v908_v23, %v906_v17 }
 0x22a   : > { %v313_v27 = vpack.c.bf16 %v312_v25, %v312_v25 }
 0x22c   : > { %850 = vmatmul.mubr.msk.bf16.vlgmr.msra.gmra.mrb[0].mxu1 %vm254_vm1, %v313_v27 }
 0x22d   : > { %854 = vmatpush3.bf16.xpose.msra.mxu1 %v371_v26  ;;  %855 = vmatprep.mubr.msk.bf16.mxu1 %vm930_vm0, %v929_v0 }
 0x22e   : > { %865 = vmatprep.subr.bf16.mxu1 %v929_v0 }
 0x234   : > { %856 = vmatmul.mubr.msk.bf16.vlgmr.msra.gmra.mrb[4].mxu1 %vm254_vm1, %v363_v28 }
 0x235   : > { %866 = vmatpush3.bf16.xpose.msra.mxu1 %v483_v31  ;;  %867 = vmatprep.mubr.msk.bf16.mxu1 %vm930_vm0, %v929_v0 }
 0x236   : > { %877 = vmatprep.subr.bf16.mxu1 %v929_v0 }
 0x23c   : > { %868 = vmatmul.mubr.msk.bf16.vlgmr.msra.gmra.mrb[8].mxu1 %vm254_vm1, %v476_v30 }
 0x23d   : > { %878 = vmatpush3.bf16.xpose.msra.mxu1 %v594_v33  ;;  %879 = vmatprep.mubr.msk.bf16.mxu1 %vm930_vm0, %v929_v0 }
 0x244   : > { %880 = vmatmul.mubr.msk.bf16.vlgmr.msra.gmra.mrb[12].mxu1 %vm254_vm1, %v587_v34 }
 0x2ff   : > { %v1032_v35 = vpop.f32.mrb[0].mxu1 }
 0x300   : > { %v851_v36 = vpop.f32.mrb[1].mxu1 }
 0x301   : > { %v358_v37 = vpop.f32.mrb[2].mxu1 }
 0x302   : > { %v852_v38 = vpop.f32.mrb[3].mxu1 }
 0x307   : > { %v407_v39 = vpop.f32.mrb[4].mxu1 }
 0x308   : > { %v413_v40 = vsel %vm250_vm2, -1e+10, %v407_v39  ;;  %v857_v41 = vpop.f32.mrb[5].mxu1 }
 0x309   : > { %v410_v42 = vpop.f32.mrb[6].mxu1  ;;  %v414_v43 = vsel %vm254_vm1, %v413_v40, -inf }
 0x30a   : > { %415 = vmax.xlane.f32.xlu1 %v414_v43  ;;  %v858_v44 = vpop.f32.mrb[7].mxu1 }
 0x30f   : > { %v519_v45 = vpop.f32.mrb[8].mxu1 }
 0x310   : > { %v525_v46 = vsel %vm250_vm2, -1e+10, %v519_v45  ;;  %v869_v47 = vpop.f32.mrb[9].mxu1 }
 0x311   : > { %v526_v48 = vsel %vm254_vm1, %v525_v46, -inf  ;;  %v522_v49 = vpop.f32.mrb[10].mxu1 }
 0x312   : > { %527 = vmax.xlane.f32.xlu0 %v526_v48  ;;  %v870_v50 = vpop.f32.mrb[11].mxu1 }
 0x317   : > { %v630_v51 = vpop.f32.mrb[12].mxu1 }
 0x318   : > { %v636_v52 = vsel %vm250_vm2, -1e+10, %v630_v51  ;;  %v881_v53 = vpop.f32.mrb[13].mxu1 }
 0x319   : > { %v637_v54 = vsel %vm254_vm1, %v636_v52, -inf  ;;  %v633_v55 = vpop.f32.mrb[14].mxu1 }
 0x31a   : > { %638 = vmax.xlane.f32.xlu1 %v637_v54  ;;  %v882_v56 = vpop.f32.mrb[15].mxu1 }
 0x397   : > { %v416_v57 = vpop.xlane.xlu1 %415 }
 0x398   : > { %v417_v58 = vsub.f32 %v413_v40, %v416_v57 }
 0x39a   : > { %v418_v59 = vmul.f32 1.442695, %v417_v58 }
 0x39c   : > { %909 = vpow2.f32 %v418_v59 }
 0x39f   : > { %v528_v60 = vpop.xlane.xlu0 %527 }
 0x3a0   : > { %v529_v61 = vsub.f32 %v525_v46, %v528_v60 }
 0x3a2   : > { %v530_v62 = vmul.f32 1.442695, %v529_v61 }
 0x3a4   : > { %911 = vpow2.f32 %v530_v62 }
 0x3a6   : > { %v910_v63 = vpop.eup %909 }
 0x3a7   : > { %v420_v1 = vsel %vm254_vm1, %v910_v63, 0.0  ;;  %v639_v4 = vpop.xlane.xlu1 %638 }
 0x3a8   : > { %421 = vadd.xlane.f32.xlu1 %v420_v1  ;;  %v640_v5 = vsub.f32 %v636_v52, %v639_v4 }
 0x3aa   : > { %v641_v6 = vmul.f32 1.442695, %v640_v5 }
 0x3ac   : > { %913 = vpow2.f32 %v641_v6 }
 0x3ae   : > { %v912_v2 = vpop.eup %911 }
 0x3af   : > { %v532_v3 = vsel %vm254_vm1, %v912_v2, 0.0 }
 0x3b0   : > { %533 = vadd.xlane.f32.xlu0 %v532_v3 }
 0x3b6   : > { %v914_v7 = vpop.eup %913 }
 0x3b7   : > { %v643_v8 = vsel %vm254_vm1, %v914_v7, 0.0 }
 0x3b9   : > { %538 = vrot.lane.b32.xlu1 %v1011_v20, %s932_s28 }
 0x3c6   : > { %427 = vrot.lane.b32.xlu0 %v1011_v20, %s931_s27 }
 0x3dd   : > { %644 = vadd.xlane.f32.xlu1 %v643_v8 }
 0x3ee   : > { %649 = vrot.lane.b32.xlu1 %v1011_v20, %s933_s29 }
 0x435   : > { %v422_v9 = vpop.xlane.xlu1 %421 }
 0x436   : > { %915 = vrcp.f32 %v422_v9 }
 0x439   : > { %v539_v15 = vpop.permute.xlu1 %538 }
 0x43a   : > { %v544_v17 = vsel %vm317_vm3, %v539_v15, 0 }
 0x43d   : > { %v534_v10 = vpop.xlane.xlu0 %533 }
 0x43e   : > { %917 = vrcp.f32 %v534_v10 }
 0x440   : > { %v916_v11 = vpop.eup %915 }
 0x441   : > { %v424_v12 = vmul.f32 %v916_v11, %v910_v63  ;;  %v428_v13 = vpop.permute.xlu0 %427 }
 0x442   : > { %v433_v14 = vsel %vm317_vm3, %v428_v13, 0 }
 0x443   : > { %860 = vmatpush3.bf16.msra.mxu0 %v433_v14  ;;  %v425_v16 = vpack.c.bf16 %v424_v12, %v424_v12 }
 0x444   : > { %871 = vmatprep.subr.bf16.mxu0 %v929_v0 }
 0x446   : > { %862 = vmatmul.mubr.msk.bf16.vlgmr.msra.gmra.mrb[4].mxu0 %vm254_vm1, %v425_v16 }
 0x447   : > { %872 = vmatpush3.bf16.msra.mxu0 %v544_v17  ;;  %873 = vmatprep.mubr.msk.bf16.mxu0 %vm930_vm0, %v929_v0 }
 0x448   : > { %v918_v18 = vpop.eup %917  ;;  %883 = vmatprep.subr.bf16.mxu0 %v929_v0 }
 0x449   : > { %v536_v19 = vmul.f32 %v918_v18, %v912_v2 }
 0x44b   : > { %v537_v20 = vpack.c.bf16 %v536_v19, %v536_v19 }
 0x44e   : > { %874 = vmatmul.mubr.msk.bf16.vlgmr.msra.gmra.mrb[8].mxu0 %vm254_vm1, %v537_v20 }
 0x44f   : > { %885 = vmatprep.mubr.msk.bf16.mxu0 %vm930_vm0, %v929_v0 }
 0x46a   : > { %v645_v21 = vpop.xlane.xlu1 %644 }
 0x46b   : > { %919 = vrcp.f32 %v645_v21 }
 0x46e   : > { %v650_v22 = vpop.permute.xlu1 %649 }
 0x46f   : > { %v655_v23 = vsel %vm317_vm3, %v650_v22, 0 }
 0x470   : > { %884 = vmatpush3.bf16.msra.mxu0 %v655_v23 }
 0x475   : > { %v920_v24 = vpop.eup %919 }
 0x476   : > { %v647_v25 = vmul.f32 %v920_v24, %v914_v7 }
 0x478   : > { %v648_v26 = vpack.c.bf16 %v647_v25, %v647_v25 }
 0x47a   : > { %886 = vmatmul.mubr.msk.bf16.vlgmr.msra.gmra.mrb[12].mxu0 %vm254_vm1, %v648_v26 }
 0x519   : > { %v469_v27 = vpop.f32.mrb[4].mxu0 }
 0x51a   : > { %698 = vrot.lane.b32.xlu0 %v469_v27, %s934_s7  ;;  %v863_v28 = vpop.f32.mrb[5].mxu0 }
 0x51b   : > { %v472_v29 = vpop.f32.mrb[6].mxu0 }
 0x51c   : > { %v864_v30 = vpop.f32.mrb[7].mxu0 }
 0x521   : > { %v580_v31 = vpop.f32.mrb[8].mxu0 }
 0x522   : > { %702 = vrot.lane.b32.xlu1 %v580_v31, %s935_s8  ;;  %v875_v0 = vpop.f32.mrb[9].mxu0 }
 0x523   : > { %v583_v32 = vpop.f32.mrb[10].mxu0 }
 0x524   : > { %v876_v33 = vpop.f32.mrb[11].mxu0 }
 0x54d   : > { %v691_v34 = vpop.f32.mrb[12].mxu0 }
 0x54e   : > { %706 = vrot.lane.b32.xlu0 %v691_v34, %s936_s9  ;;  %v887_v36 = vpop.f32.mrb[13].mxu0 }
 0x54f   : > { %v694_v37 = vpop.f32.mrb[14].mxu0 }
 0x550   : > { %v888_v38 = vpop.f32.mrb[15].mxu0 }
 0x58c   : > { %v699_v39 = vpop.permute.xlu0 %698 }
 0x58d   : > { %v709_v41 = vsel %vm254_vm1, %v1032_v35, %v699_v39 }
 0x594   : > { %v703_v40 = vpop.permute.xlu1 %702 }
 0x595   : > { %v711_v42 = vsel %vm710_vm4, %v709_v41, %v703_v40 }
 0x5c0   : > { %v707_v43 = vpop.permute.xlu0 %706 }
 0x5c1   : > { %v713_v44 = vsel %vm712_vm5, %v711_v42, %v707_v43 }
 0x5c2   : > { %715 = vst.msk [vmem:[%s243_s12] sm:$0xff] %vm714_vm6, %v713_v44 }
 0x5c3 PF: > { %s14_s15 = sadd.s32 1, %s927_s15  }
 0x5c4   : > { %p11_p4 = scmp.ge.s32.totalorder %s14_s15, 4  }
 0x5c6   :  { %13 = sbr.rel (!%p11_p4) target bundleno = 1 (0x1), region = 75 }

// kernel: decoder_forward.21
= control target key start
LH: loop header
LB: loop body
LE: loop exit
PB: predicated region body
PF: predicated region fallthrough
CT: control target
= control target key end

     0   :  { %v112_v0 = vmov 0.0   ;;  %vm113_vm0 = vmmov 0   ;;  %vm41_vm1 = vcmask 261120   ;;  %vm86_vm2 = vcmask 523264   ;;  %s155_s1 = inlined_call_operand.vmem [shape: bf16[32,64], index: 1, kind: input, shape index: {}]   ;;  %s156_s0 = inlined_call_operand.vmem [shape: f32[16,32], index: 0, kind: input, shape index: {}]   ;;  %s157_s2 = inlined_call_operand.vmem [shape: f32[1,64], index: 2, kind: input, shape index: {}]   ;;  %s158_s3 = inlined_call_operand.vmem [shape: f32[16,64], index: 3, kind: output, shape index: {}]  }
   0x1   :  { %100 = vmatprep.subr.bf16.mxu0 %v112_v0  ;;  %v110_v1 = vld [vmem:[%s155_s1] sm:$0xff]   ;;  %104 = vmatprep.mubr.msk.bf16.mxu0 %vm113_vm0, %v112_v0  ;;  %v111_v2 = vld [vmem:[%s155_s1 + $0x8] sm:$0xff]  }
   0x2   :  { %101 = vmatpush3.bf16.msra.mxu0 %v110_v1  ;;  %v15_v3 = vld [vmem:[%s156_s0] sm:$0xff]  ;;  %v16_v4 = vld [vmem:[%s156_s0 + $0x8] sm:$0xff] }
   0x3   :  { %102 = vmatprep.subr.bf16.mxu0 %v112_v0  ;;  %v17_v5 = vpack.c.bf16 %v16_v4, %v15_v3  ;;  %v93_v6 = vld [vmem:[%s157_s2] ss:$0 sm:$0xff] }
   0x6   :  { %103 = vmatpush3.bf16.msra.mxu0 %v111_v2 }
   0x9   :  { %105 = vmatmul.mubr.msk.bf16.vlgmr.msra.gmra.mrb[0].mxu0 %vm41_vm1, %v17_v5 }
  0xdc   :  { %v79_v7 = vpop.f32.mrb[0].mxu0 }
  0xdd   :  { %v80_v8 = vadd.f32 %v93_v6, %v79_v7  ;;  %v106_v9 = vpop.f32.mrb[1].mxu0 }
  0xde   :  { %v82_v10 = vpop.f32.mrb[2].mxu0 }
  0xdf   :  { %87 = vst.msk [vmem:[%s158_s3] sm:$0xff] %vm86_vm2, %v80_v8  ;;  %v83_v11 = vadd.f32 %v93_v6, %v82_v10  ;;  %v107_v12 = vpop.f32.mrb[3].mxu0 }
  0xe1   :  { %88 = vst.msk [vmem:[%s158_s3 + $0x8] sm:$0xff] %vm86_vm2, %v83_v11 }

// kernel: decoder_forward.33
= control target key start
LH: loop header
LB: loop body
LE: loop exit
PB: predicated region body
PF: predicated region fallthrough
CT: control target
= control target key end

     0   :  { %vm19_vm0 = vcmask 261120   ;;  %s186_s0 = inlined_call_operand.vmem [shape: f32[16,32], index: 0, kind: input, shape index: {}]   ;;  %s187_s1 = inlined_call_operand.vmem [shape: f32[1,32], index: 1, kind: input, shape index: {}]   ;;  %s188_s2 = inlined_call_operand.vmem [shape: f32[1,32], index: 2, kind: input, shape index: {}]   ;;  %s189_s3 = inlined_call_operand.hbm [shape: f32[16,32], index: 3, kind: output, shape index: {}]  }
   0x1   :  { %v15_v0 = vld [vmem:[%s186_s0] sm:$0xff]  ;;  %v16_v1 = vld [vmem:[%s186_s0 + $0x8] sm:$0xff] }
   0x2   :  { %v20_v2 = vsel %vm19_vm0, %v15_v0, 0.0 }
   0x3   :  { %8 = vsyncpa [#allocation3], 0  ;;  %21 = vadd.xlane.f32.xlu0 %v20_v2  ;;  %v23_v3 = vsel %vm19_vm0, %v16_v1, 0.0  ;;  %v96_v30 = vld [vmem:[%s187_s1] ss:$0 sm:$0xff]  ;;  %s133_s19 = smov [#allocation2]  }
   0x4   :  { %v97_v33 = vld [vmem:[%s188_s2] ss:$0 sm:$0xff]  ;;  %s85_s20 = sshll.u32 %s133_s19, 4  ;;  %s86_s20 = int_to_ptr.vmem [resolvable:$true] %s85_s20 }
   0x5   :  { %s109_s1 = scalar_lea.vmem %s86_s20, 256  ;;  %p114_p1 = scmp.lt.s32.totalorder %s86_s20, %s86_s20 }
   0x6   :  { %p110_p0 = scmp.ne.s32.totalorder %s86_s20, %s109_s1  ;;  %p115_p2 = scmp.lt.s32.totalorder %s109_s1, %s109_s1 }
   0x7   :  { %24 = vadd.xlane.f32.xlu0 %v23_v3 }
   0x8   :  { %p116_p3 = por %p115_p2, %p114_p1 }
   0xa   :  { %p117_p4 = pnand %p116_p3, %p110_p0 }
  0x90   :  { %v22_v4 = vpop.xlane.xlu0 %21 }
  0x91   :  { %v27_v5 = vmul.f32 0.03125, %v22_v4 }
  0x93   :  { %v29_v6 = vsub.f32 %v15_v0, %v27_v5 }
  0x94   :  { %v25_v7 = vpop.xlane.xlu0 %24 }
  0x95   :  { %v28_v8 = vmul.f32 0.03125, %v25_v7  ;;  %v31_v9 = vmul.f32 %v29_v6, %v29_v6  ;;  %v48_v31 = vmul.f32 %v96_v30, %v29_v6 }
  0x97   :  { %v30_v10 = vsub.f32 %v16_v1, %v28_v8  ;;  %v33_v11 = vsel %vm19_vm0, %v31_v9, 0.0 }
  0x98   :  { %34 = vadd.xlane.f32.xlu1 %v33_v11 }
  0x99   :  { %v32_v12 = vmul.f32 %v30_v10, %v30_v10  ;;  %v49_v35 = vmul.f32 %v96_v30, %v30_v10 }
  0x9b   :  { %v36_v13 = vsel %vm19_vm0, %v32_v12, 0.0 }
  0x9c   :  { %37 = vadd.xlane.f32.xlu1 %v36_v13 }
 0x125   :  { %v35_v14 = vpop.xlane.xlu1 %34 }
 0x126   :  { %v40_v15 = vmul.f32 0.032258064, %v35_v14 }
 0x128   :  { %101 = vrsqrt.f32 %v40_v15  ;;  %vm52_vm1 = vcmp.eq.f32.partialorder %v40_v15, inf  ;;  %v55_v20 = vand.u32 2147483648, %v40_v15  ;;  %vm54_vm2 = vcmp.eq.f32.partialorder %v40_v15, 0.0 }
 0x129   :  { %v38_v16 = vpop.xlane.xlu1 %37 }
 0x12a   :  { %v41_v17 = vmul.f32 0.032258064, %v38_v16 }
 0x12c   :  { %103 = vrsqrt.f32 %v41_v17  ;;  %vm59_vm3 = vcmp.eq.f32.partialorder %v41_v17, inf  ;;  %v62_v26 = vand.u32 2147483648, %v41_v17  ;;  %vm61_vm4 = vcmp.eq.f32.partialorder %v41_v17, 0.0 }
 0x132   :  { %v102_v18 = vpop.eup %101 }
 0x133   :  { %v51_v19 = vmul.f32 %v102_v18, %v40_v15 }
 0x135   :  { %v53_v21 = vsel %vm52_vm1, %v40_v15, %v51_v19 }
 0x136   :  { %v104_v22 = vpop.eup %103  ;;  %v56_v23 = vsel %vm54_vm2, %v55_v20, %v53_v21 }
 0x137   :  { %v64_v24 = vadd.f32 1e-06, %v56_v23  ;;  %v58_v25 = vmul.f32 %v104_v22, %v41_v17 }
 0x139   :  { %105 = vrcp.f32 %v64_v24  ;;  %v60_v27 = vsel %vm59_vm3, %v41_v17, %v58_v25 }
 0x13a   :  { %v63_v28 = vsel %vm61_vm4, %v62_v26, %v60_v27 }
 0x13b   :  { %v65_v29 = vadd.f32 1e-06, %v63_v28 }
 0x13d   :  { %107 = vrcp.f32 %v65_v29 }
 0x143   :  { %v106_v32 = vpop.eup %105 }
 0x144   :  { %v67_v34 = vmul.f32 %v106_v32, %v48_v31 }
 0x146   :  { %v76_v36 = vadd.f32 %v97_v33, %v67_v34 }
 0x147   :  { %v108_v37 = vpop.eup %107 }
 0x148   :  { %v69_v38 = vmul.f32 %v108_v37, %v49_v35  ;;  %78 = vst.msk [vmem:[#allocation2] sm:$0xff] %vm19_vm0, %v76_v36 }
 0x14a   :  { %v77_v39 = vadd.f32 %v97_v33, %v69_v38 }
 0x14c   :  { %79 = vst.msk [vmem:[#allocation2 + $0x8] sm:$0xff] %vm19_vm0, %v77_v39 }
 0x14d   :  { %120 = shalt.err (!%p117_p4)
}
 0x14e   :  { %s121_s22 = scalar_lea.hbm %s189_s3, 256 }
 0x14f   :  { %p122_p5 = scmp.ne.s32.totalorder %s189_s3, %s121_s22  ;;  %p125_p6 = scmp.lt.u32.totalorder %s121_s22, %s189_s3 }
 0x151   :  { %p127_p7 = pnand %p125_p6, %p122_p5 }
 0x153   :  { %130 = shalt.err (!%p127_p7)
}
 0x154   :  { %s134_s27 = smov 128   ;;  %s135_s28 = smov 8  }
 0x155   :  { %91 = dma.vmem_to_hbm [thread:$0]  %s86_s20, 256, %s189_s3, [#allocation3], %s134_s27, %s134_s27, %s135_s28  }
 0x156   :  { %131 = dma.done.wait [#allocation3], 256  }
 0x157   :  { %132 = vsyncadd [#allocation3], 4294967040 }
 0x158   :  { %95 = vsyncpa [#allocation3], 1 }

// kernel: decoder_forward.24
= control target key start
LH: loop header
LB: loop body
LE: loop exit
PB: predicated region body
PF: predicated region fallthrough
CT: control target
= control target key end

     0   :  { %vm31_vm0 = vcmask 261120   ;;  %v309_v14 = vmov 0.0   ;;  %vm310_vm1 = vmmov 0   ;;  %vm200_vm6 = vcmask 523264   ;;  %s410_s0 = inlined_call_operand.vmem [shape: f32[16,32], index: 0, kind: input, shape index: {}]   ;;  %s411_s3 = inlined_call_operand.vmem [shape: bf16[32,64], index: 3, kind: input, shape index: {}]   ;;  %s412_s5 = inlined_call_operand.vmem [shape: bf16[64,32], index: 5, kind: input, shape index: {}]   ;;  %s413_s1 = inlined_call_operand.vmem [shape: f32[1,32], index: 1, kind: input, shape index: {}]   ;;  %s414_s2 = inlined_call_operand.vmem [shape: f32[1,32], index: 2, kind: input, shape index: {}]   ;;  %s415_s4 = inlined_call_operand.vmem [shape: f32[1,64], index: 4, kind: input, shape index: {}]   ;;  %s416_s6 = inlined_call_operand.vmem [shape: f32[1,32], index: 6, kind: input, shape index: {}]   ;;  %s417_s7 = inlined_call_operand.vmem [shape: f32[16,32], index: 7, kind: output, shape index: {}]  }
   0x1   :  { %v354_v0 = vld [vmem:[%s410_s0] sm:$0xff]  ;;  %v359_v1 = vld [vmem:[%s410_s0 + $0x8] sm:$0xff]  ;;  %273 = vmatprep.subr.bf16.mxu0 %v309_v14  ;;  %277 = vmatprep.mubr.msk.bf16.mxu0 %vm310_vm1, %v309_v14  ;;  %v299_v46 = vld [vmem:[%s412_s5 + $0x10] sm:$0xff]  }
   0x2   :  { %v32_v2 = vsel %vm31_vm0, %v354_v0, 0.0  ;;  %v35_v3 = vsel %vm31_vm0, %v359_v1, 0.0  ;;  %v295_v15 = vld [vmem:[%s411_s3] sm:$0xff]   ;;  %281 = vmatprep.subr.bf16.mxu1 %v309_v14  ;;  %289 = vmatprep.mubr.msk.bf16.mxu1 %vm310_vm1, %v309_v14  ;;  %v296_v16 = vld [vmem:[%s411_s3 + $0x8] sm:$0xff]   ;;  %v300_v47 = vld [vmem:[%s412_s5 + $0x18] sm:$0xff]  }
   0x3   :  { %33 = vadd.xlane.f32.xlu0 %v32_v2  ;;  %274 = vmatpush3.bf16.msra.mxu0 %v295_v15  ;;  %v297_v17 = vld [vmem:[%s412_s5] sm:$0xff]   ;;  %v298_v18 = vld [vmem:[%s412_s5 + $0x8] sm:$0xff]  }
   0x4   :  { %275 = vmatprep.subr.bf16.mxu0 %v309_v14  ;;  %282 = vmatpush3.bf16.msra.mxu1 %v297_v17  ;;  %v253_v35 = vld [vmem:[%s413_s1] ss:$0 sm:$0xff] }
   0x5   :  { %283 = vmatprep.subr.bf16.mxu1 %v309_v14  ;;  %v254_v41 = vld [vmem:[%s414_s2] ss:$0 sm:$0xff] }
   0x6   :  { %v255_v48 = vld [vmem:[%s415_s4] ss:$0 sm:$0xff] }
   0x7   :  { %36 = vadd.xlane.f32.xlu0 %v35_v3  ;;  %276 = vmatpush3.bf16.msra.mxu0 %v296_v16  ;;  %v259_v58 = vld [vmem:[%s416_s6] ss:$0 sm:$0xff] }
   0x8   :  { %284 = vmatpush3.bf16.msra.mxu1 %v298_v18 }
   0x9   :  { %285 = vmatprep.subr.bf16.mxu1 %v309_v14 }
   0xc   :  { %286 = vmatpush3.bf16.msra.mxu1 %v299_v46 }
   0xd   :  { %287 = vmatprep.subr.bf16.mxu1 %v309_v14 }
  0x10   :  { %288 = vmatpush3.bf16.msra.mxu1 %v300_v47 }
  0x90   :  { %v34_v4 = vpop.xlane.xlu0 %33 }
  0x91   :  { %v39_v5 = vmul.f32 0.03125, %v34_v4 }
  0x93   :  { %v41_v6 = vsub.f32 %v354_v0, %v39_v5 }
  0x94   :  { %v37_v7 = vpop.xlane.xlu0 %36 }
  0x95   :  { %v40_v8 = vmul.f32 0.03125, %v37_v7  ;;  %v43_v9 = vmul.f32 %v41_v6, %v41_v6  ;;  %v60_v37 = vmul.f32 %v253_v35, %v41_v6 }
  0x97   :  { %v42_v10 = vsub.f32 %v359_v1, %v40_v8  ;;  %v45_v11 = vsel %vm31_vm0, %v43_v9, 0.0 }
  0x98   :  { %46 = vadd.xlane.f32.xlu1 %v45_v11 }
  0x99   :  { %v44_v12 = vmul.f32 %v42_v10, %v42_v10  ;;  %v61_v38 = vmul.f32 %v253_v35, %v42_v10 }
  0x9b   :  { %v48_v13 = vsel %vm31_vm0, %v44_v12, 0.0 }
  0x9c   :  { %49 = vadd.xlane.f32.xlu1 %v48_v13 }
 0x125   :  { %v47_v19 = vpop.xlane.xlu1 %46 }
 0x126   :  { %v52_v20 = vmul.f32 0.032258064, %v47_v19 }
 0x128   :  { %301 = vrsqrt.f32 %v52_v20  ;;  %vm64_vm2 = vcmp.eq.f32.partialorder %v52_v20, inf  ;;  %v67_v25 = vand.u32 2147483648, %v52_v20  ;;  %vm66_vm3 = vcmp.eq.f32.partialorder %v52_v20, 0.0 }
 0x129   :  { %v50_v21 = vpop.xlane.xlu1 %49 }
 0x12a   :  { %v53_v22 = vmul.f32 0.032258064, %v50_v21 }
 0x12c   :  { %303 = vrsqrt.f32 %v53_v22  ;;  %vm71_vm4 = vcmp.eq.f32.partialorder %v53_v22, inf  ;;  %v74_v31 = vand.u32 2147483648, %v53_v22  ;;  %vm73_vm5 = vcmp.eq.f32.partialorder %v53_v22, 0.0 }
 0x132   :  { %v302_v23 = vpop.eup %301 }
 0x133   :  { %v63_v24 = vmul.f32 %v302_v23, %v52_v20 }
 0x135   :  { %v65_v26 = vsel %vm64_vm2, %v52_v20, %v63_v24 }
 0x136   :  { %v304_v27 = vpop.eup %303  ;;  %v68_v28 = vsel %vm66_vm3, %v67_v25, %v65_v26 }
 0x137   :  { %v76_v29 = vadd.f32 1e-06, %v68_v28  ;;  %v70_v30 = vmul.f32 %v304_v27, %v53_v22 }
 0x139   :  { %305 = vrcp.f32 %v76_v29  ;;  %v72_v32 = vsel %vm71_vm4, %v53_v22, %v70_v30 }
 0x13a   :  { %v75_v33 = vsel %vm73_vm5, %v74_v31, %v72_v32 }
 0x13b   :  { %v77_v34 = vadd.f32 1e-06, %v75_v33 }
 0x13d   :  { %307 = vrcp.f32 %v77_v34 }
 0x143   :  { %v306_v36 = vpop.eup %305 }
 0x144   :  { %v79_v39 = vmul.f32 %v306_v36, %v60_v37 }
 0x146   :  { %v88_v43 = vadd.f32 %v254_v41, %v79_v39 }
 0x147   :  { %v308_v40 = vpop.eup %307 }
 0x148   :  { %v81_v42 = vmul.f32 %v308_v40, %v61_v38 }
 0x14a   :  { %v89_v44 = vadd.f32 %v254_v41, %v81_v42 }
 0x14c   :  { %v90_v45 = vpack.c.bf16 %v89_v44, %v88_v43 }
 0x14e   :  { %278 = vmatmul.mubr.msk.bf16.vlgmr.msra.gmra.mrb[0].mxu0 %vm31_vm0, %v90_v45 }
 0x221   :  { %v151_v49 = vpop.f32.mrb[0].mxu0 }
 0x222   :  { %v152_v50 = vadd.f32 %v255_v48, %v151_v49  ;;  %v279_v51 = vpop.f32.mrb[1].mxu0 }
 0x223   :  { %v154_v52 = vpop.f32.mrb[2].mxu0 }
 0x224   :  { %v155_v53 = vadd.f32 %v255_v48, %v154_v52  ;;  %v280_v54 = vpop.f32.mrb[3].mxu0  ;;  %v158_v55 = vmax.f32 %v152_v50, 0.0 }
 0x226   :  { %v159_v56 = vmax.f32 %v155_v53, 0.0 }
 0x228   :  { %v160_v57 = vpack.c.bf16 %v159_v56, %v158_v55 }
 0x22a   :  { %290 = vmatmul.mubr.msk.bf16.vlgmr.msra.gmra.mrb[0].mxu1 %vm200_vm6, %v160_v57 }
 0x2fd   :  { %v238_v59 = vpop.f32.mrb[0].mxu1 }
 0x2fe   :  { %v239_v60 = vadd.f32 %v259_v58, %v238_v59  ;;  %v291_v61 = vpop.f32.mrb[1].mxu1 }
 0x2ff   :  { %v241_v62 = vpop.f32.mrb[2].mxu1 }
 0x300   :  { %v245_v63 = vadd.f32 %v239_v60, %v354_v0  ;;  %v242_v2 = vadd.f32 %v259_v58, %v241_v62  ;;  %v292_v3 = vpop.f32.mrb[3].mxu1 }
 0x302   :  { %247 = vst.msk [vmem:[%s417_s7] sm:$0xff] %vm31_vm0, %v245_v63  ;;  %v246_v4 = vadd.f32 %v242_v2, %v359_v1 }
 0x304   :  { %248 = vst.msk [vmem:[%s417_s7 + $0x8] sm:$0xff] %vm31_vm0, %v246_v4 }

</bundles_post_ra>
